<compile_context>
chip_gen: v6e
topology: v6e:2x2x1
jax: 0.10.0
libtpu: 0.0.40
codegen_flags: <defaults>
</compile_context>

<pallas_src>
import functools

import jax
import jax.numpy as jnp
from jax.experimental import pallas as pl
from jax.experimental.pallas import tpu as pltpu

CP = 128  # lane-dense channel padding (one full vreg lane width)


def _tcn_fused_kernel(x_ref, *refs, L, k, P_max, layer_meta):
    """Fused TCN stack for ONE batch element (grid is over batch).

    x_ref  : (L, CP)  channel-padded, channels-last input (f32)
    refs   : per-layer weight refs  [w1f, b1, w2f, b2, (wdf, bd)] * n_layers
             then o_ref (L, CP) and two VMEM scratch buffers (P_max+L, CP).
    Weights w1f/w2f are (k*CP, CP) bf16 (k taps flattened into contraction),
    wdf is (CP, CP) bf16, biases are (1, CP) f32.
    """
    n_w = sum(6 if hd else 4 for _, hd in layer_meta)
    w_refs = refs[:n_w]
    o_ref, buf_x, buf_h = refs[n_w], refs[n_w + 1], refs[n_w + 2]

    # In-kernel causal padding: keep the top P_max rows permanently zero.
    if P_max > 0:
        zpad = jnp.zeros((P_max, CP), jnp.float32)
        buf_x[0:P_max, :] = zpad
        buf_h[0:P_max, :] = zpad

    # Stage the (already lane-padded) input for layer 0.
    buf_x[P_max:P_max + L, :] = x_ref[...]

    idx = 0
    n_layers = len(layer_meta)
    for li, (dilation, has_down) in enumerate(layer_meta):
        w1 = w_refs[idx]
        b1 = w_refs[idx + 1]
        w2 = w_refs[idx + 2]
        b2 = w_refs[idx + 3]
        if has_down:
            wd = w_refs[idx + 4]
            bd = w_refs[idx + 5]
            idx += 6
        else:
            wd = bd = None
            idx += 4

        P = dilation * (k - 1)
        base = P_max - P  # rows [base, base+P) of the buffer are zeros

        def taps_cat(buf, base=base, dilation=dilation):
            # k shifted causal slices, concatenated along the channel (lane)
            # axis -> single matmul with contraction K = k*CP.
            ts = [buf[base + j * dilation: base + j * dilation + L, :]
                  for j in range(k)]
            return ts[0] if k == 1 else jnp.concatenate(ts, axis=-1)

        # ---- conv1 (causal dilated) + bias + ReLU; dropout1 = identity ----
        xcat = taps_cat(buf_x)                                  # (L, k*CP) f32
        acc1 = jnp.dot(xcat.astype(jnp.bfloat16), w1[...],
                       preferred_element_type=jnp.float32)
        h1 = jnp.maximum(acc1 + b1[...], 0.0)
        buf_h[P_max:P_max + L, :] = h1                          # stage for conv2

        # ---- conv2 (causal dilated) + bias + ReLU; dropout2 = identity ----
        hcat = taps_cat(buf_h)
        acc2 = jnp.dot(hcat.astype(jnp.bfloat16), w2[...],
                       preferred_element_type=jnp.float32)
        h2 = jnp.maximum(acc2 + b2[...], 0.0)

        # ---- residual branch + final ReLU ----
        x_in = buf_x[P_max:P_max + L, :]                        # (L, CP) f32
        if has_down:
            res = jnp.dot(x_in.astype(jnp.bfloat16), wd[...],
                          preferred_element_type=jnp.float32) + bd[...]
        else:
            res = x_in
        out = jnp.maximum(h2 + res, 0.0)

        if li == n_layers - 1:
            o_ref[...] = out.astype(o_ref.dtype)                # lane-dense store
        else:
            buf_x[P_max:P_max + L, :] = out                     # next layer input


def _pad_axis(a, axis, size):
    pad = [(0, 0)] * a.ndim
    pad[axis] = (0, size - a.shape[axis])
    return jnp.pad(a, pad)


def init_tcn_params(key, num_inputs, num_channels, kernel_size):
    """Deterministic synthetic parameters (conv weights ~ N(0, 0.01))."""
    params = []
    in_ch = num_inputs
    for i, out_ch in enumerate(num_channels):
        key, k0, k1, k2, k3, k4, k5 = jax.random.split(key, 7)
        w1 = 0.01 * jax.random.normal(k0, (kernel_size, in_ch, out_ch), jnp.float32)
        b1 = 0.10 * jax.random.normal(k1, (1, out_ch), jnp.float32)
        w2 = 0.01 * jax.random.normal(k2, (kernel_size, out_ch, out_ch), jnp.float32)
        b2 = 0.10 * jax.random.normal(k3, (1, out_ch), jnp.float32)
        if in_ch != out_ch:
            wd = 0.01 * jax.random.normal(k4, (in_ch, out_ch), jnp.float32)
            bd = 0.10 * jax.random.normal(k5, (1, out_ch), jnp.float32)
        else:
            wd, bd = None, None
        params.append(dict(w1=w1, b1=b1, w2=w2, b2=b2, wd=wd, bd=bd,
                           dilation=2 ** i))
        in_ch = out_ch
    return params


def _prep_layer_args(params, kernel_size):
    """Lane-pad channels to CP, flatten the k taps into the contraction axis,
    cast matmul weights to bf16 (biases stay f32)."""
    args, meta = [], []
    k = kernel_size
    for p in params:
        w1 = _pad_axis(_pad_axis(p["w1"], 1, CP), 2, CP)       # (k, CP, CP)
        w2 = _pad_axis(_pad_axis(p["w2"], 1, CP), 2, CP)
        w1f = w1.reshape(k * CP, CP).astype(jnp.bfloat16)
        w2f = w2.reshape(k * CP, CP).astype(jnp.bfloat16)
        b1 = _pad_axis(p["b1"], 1, CP)                          # (1, CP) f32
        b2 = _pad_axis(p["b2"], 1, CP)
        layer_args = [w1f, b1, w2f, b2]
        has_down = p["wd"] is not None
        if has_down:
            wdf = _pad_axis(_pad_axis(p["wd"], 0, CP), 1, CP).astype(jnp.bfloat16)
            bd = _pad_axis(p["bd"], 1, CP)
            layer_args += [wdf, bd]
        args += layer_args
        meta.append((p["dilation"], has_down))
    return args, meta


def temporal_conv_net(x_nct, params, kernel_size):
    """x_nct: PyTorch layout (B, C_in, L). Returns (B, C_out_last, L)."""
    B, _, L = x_nct.shape
    c_last = params[-1]["w1"].shape[2]
    k = kernel_size

    w_args, layer_meta = _prep_layer_args(params, k)
    P_max = max(d * (k - 1) for d, _ in layer_meta)

    # channels-last + single lane-dense channel pad (no per-layer jnp.pad)
    x_blc = _pad_axis(jnp.transpose(x_nct, (0, 2, 1)).astype(jnp.float32), 2, CP)

    kernel = functools.partial(_tcn_fused_kernel, L=L, k=k,
                               P_max=P_max, layer_meta=tuple(layer_meta))

    in_specs = [pl.BlockSpec((None, L, CP), lambda b: (b, 0, 0))]
    for a in w_args:
        in_specs.append(pl.BlockSpec(a.shape, lambda b: (0, 0)))  # all weights 2D

    out = pl.pallas_call(
        kernel,
        out_shape=jax.ShapeDtypeStruct((B, L, CP), jnp.float32),
        grid=(B,),
        in_specs=in_specs,
        out_specs=pl.BlockSpec((None, L, CP), lambda b: (b, 0, 0)),
        scratch_shapes=[pltpu.VMEM((P_max + L, CP), jnp.float32),
                        pltpu.VMEM((P_max + L, CP), jnp.float32)],
        compiler_params=pltpu.CompilerParams(
            dimension_semantics=("parallel",)),
    )(x_blc, *w_args)

    # back to PyTorch NCT layout, dropping the lane padding
    return jnp.transpose(out[:, :, :c_last], (0, 2, 1))


def _tcn_reference(x_nct, params, k):
    """Pure-JAX f32 reference (mirrors the PyTorch module, eval mode)."""
    h = x_nct  # (B, C, L)
    for p in params:
        d = p["dilation"]
        P = d * (k - 1)
        L = h.shape[-1]

        def causal_conv(inp, w, b):  # inp (B, Cin, L), w (k, Cin, Cout)
            xp = jnp.pad(inp, ((0, 0), (0, 0), (P, 0)))
            acc = jnp.zeros((inp.shape[0], L, w.shape[2]), jnp.float32)
            for j in range(k):
                acc = acc + jnp.einsum('bcl,co->blo',
                                       xp[:, :, j * d:j * d + L], w[j])
            return acc + b

        h1 = jax.nn.relu(causal_conv(h, p["w1"], p["b1"]))          # (B, L, C1)
        h2 = jax.nn.relu(causal_conv(jnp.transpose(h1, (0, 2, 1)),
                                     p["w2"], p["b2"]))             # (B, L, C1)
        if p["wd"] is not None:
            res = jnp.einsum('bcl,co->blo', h, p["wd"]) + p["bd"]
        else:
            res = jnp.transpose(h, (0, 2, 1))
        h = jnp.transpose(jax.nn.relu(h2 + res), (0, 2, 1))         # (B, C, L)
    return h


if __name__ == "__main__":
    key = jax.random.PRNGKey(0)
    B, C_in, L = 2, 4, 16
    num_channels = [8, 8, 16]     # level 1 has no downsample (tests both paths)
    kernel_size = 2

    kx, kp = jax.random.split(key)
    x = jax.random.normal(kx, (B, C_in, L), jnp.float32)
    params = init_tcn_params(kp, C_in, num_channels, kernel_size)

    out = temporal_conv_net(x, params, kernel_size)
    out = jax.block_until_ready(out)
    assert out.shape == (B, num_channels[-1], L), out.shape
    assert bool(jnp.all(jnp.isfinite(out)))

    ref = _tcn_reference(x, params, kernel_size)
    assert bool(jnp.allclose(out, ref, atol=5e-2, rtol=5e-2)), \
        float(jnp.max(jnp.abs(out - ref)))
    print("KERNEL_OK")
</pallas_src>

<mosaic_0001>
module attributes {stable_mosaic.version = 11 : i64} {
  func.func @_tcn_fused_kernel(%arg0: i32, %arg1: memref<1x16x128xf32, #tpu.memory_space<vmem>>, %arg2: memref<256x128xbf16, #tpu.memory_space<vmem>>, %arg3: memref<1x128xf32, #tpu.memory_space<vmem>>, %arg4: memref<256x128xbf16, #tpu.memory_space<vmem>>, %arg5: memref<1x128xf32, #tpu.memory_space<vmem>>, %arg6: memref<128x128xbf16, #tpu.memory_space<vmem>>, %arg7: memref<1x128xf32, #tpu.memory_space<vmem>>, %arg8: memref<256x128xbf16, #tpu.memory_space<vmem>>, %arg9: memref<1x128xf32, #tpu.memory_space<vmem>>, %arg10: memref<256x128xbf16, #tpu.memory_space<vmem>>, %arg11: memref<1x128xf32, #tpu.memory_space<vmem>>, %arg12: memref<256x128xbf16, #tpu.memory_space<vmem>>, %arg13: memref<1x128xf32, #tpu.memory_space<vmem>>, %arg14: memref<256x128xbf16, #tpu.memory_space<vmem>>, %arg15: memref<1x128xf32, #tpu.memory_space<vmem>>, %arg16: memref<128x128xbf16, #tpu.memory_space<vmem>>, %arg17: memref<1x128xf32, #tpu.memory_space<vmem>>, %arg18: memref<1x16x128xf32, #tpu.memory_space<vmem>>, %arg19: memref<20x128xf32, #tpu.memory_space<vmem>>, %arg20: memref<20x128xf32, #tpu.memory_space<vmem>>) attributes {dimension_semantics = [#tpu.dimension_semantics<parallel>], iteration_bounds = array<i64: 2>, scalar_prefetch = 0 : i64, scratch_operands = 2 : i64, tpu.core_type = #tpu.core_type<tc>, window_params = [{transform_indices = @transform_0, window_bounds = array<i64: 1, 16, 128>}, {pipeline_mode = #tpu.pipeline_mode<synchronous>, transform_indices = @transform_1, window_bounds = array<i64: 256, 128>}, {pipeline_mode = #tpu.pipeline_mode<synchronous>, transform_indices = @transform_2, window_bounds = array<i64: 1, 128>}, {pipeline_mode = #tpu.pipeline_mode<synchronous>, transform_indices = @transform_3, window_bounds = array<i64: 256, 128>}, {pipeline_mode = #tpu.pipeline_mode<synchronous>, transform_indices = @transform_4, window_bounds = array<i64: 1, 128>}, {pipeline_mode = #tpu.pipeline_mode<synchronous>, transform_indices = @transform_5, window_bounds = array<i64: 128, 128>}, {pipeline_mode = #tpu.pipeline_mode<synchronous>, transform_indices = @transform_6, window_bounds = array<i64: 1, 128>}, {pipeline_mode = #tpu.pipeline_mode<synchronous>, transform_indices = @transform_7, window_bounds = array<i64: 256, 128>}, {pipeline_mode = #tpu.pipeline_mode<synchronous>, transform_indices = @transform_8, window_bounds = array<i64: 1, 128>}, {pipeline_mode = #tpu.pipeline_mode<synchronous>, transform_indices = @transform_9, window_bounds = array<i64: 256, 128>}, {pipeline_mode = #tpu.pipeline_mode<synchronous>, transform_indices = @transform_10, window_bounds = array<i64: 1, 128>}, {pipeline_mode = #tpu.pipeline_mode<synchronous>, transform_indices = @transform_11, window_bounds = array<i64: 256, 128>}, {pipeline_mode = #tpu.pipeline_mode<synchronous>, transform_indices = @transform_12, window_bounds = array<i64: 1, 128>}, {pipeline_mode = #tpu.pipeline_mode<synchronous>, transform_indices = @transform_13, window_bounds = array<i64: 256, 128>}, {pipeline_mode = #tpu.pipeline_mode<synchronous>, transform_indices = @transform_14, window_bounds = array<i64: 1, 128>}, {pipeline_mode = #tpu.pipeline_mode<synchronous>, transform_indices = @transform_15, window_bounds = array<i64: 128, 128>}, {pipeline_mode = #tpu.pipeline_mode<synchronous>, transform_indices = @transform_16, window_bounds = array<i64: 1, 128>}, {transform_indices = @transform_17, window_bounds = array<i64: 1, 16, 128>}]} {
    %cst = arith.constant 0.000000e+00 : f32
    %0 = vector.broadcast %cst : f32 to vector<4x128xf32>
    %c0 = arith.constant 0 : index
    %c0_0 = arith.constant 0 : index
    %1 = vector.load %arg19[%c0, %c0_0] : memref<20x128xf32, #tpu.memory_space<vmem>>, vector<4x128xf32>
    tpu.vector_store %arg19[%c0, %c0_0], %0 {strides = array<i32>} : memref<20x128xf32, #tpu.memory_space<vmem>>, vector<4x128xf32>,
    %c0_1 = arith.constant 0 : index
    %c0_2 = arith.constant 0 : index
    %2 = vector.load %arg20[%c0_1, %c0_2] : memref<20x128xf32, #tpu.memory_space<vmem>>, vector<4x128xf32>
    tpu.vector_store %arg20[%c0_1, %c0_2], %0 {strides = array<i32>} : memref<20x128xf32, #tpu.memory_space<vmem>>, vector<4x128xf32>,
    %c0_3 = arith.constant 0 : index
    %c0_4 = arith.constant 0 : index
    %c0_5 = arith.constant 0 : index
    %3 = vector.load %arg1[%c0_3, %c0_4, %c0_5] : memref<1x16x128xf32, #tpu.memory_space<vmem>>, vector<1x16x128xf32>
    %4 = vector.shape_cast %3 : vector<1x16x128xf32> to vector<16x128xf32>
    %c4 = arith.constant 4 : index
    %c0_6 = arith.constant 0 : index
    %5 = vector.load %arg19[%c4, %c0_6] : memref<20x128xf32, #tpu.memory_space<vmem>>, vector<16x128xf32>
    tpu.vector_store %arg19[%c4, %c0_6], %4 {strides = array<i32>} : memref<20x128xf32, #tpu.memory_space<vmem>>, vector<16x128xf32>,
    %c3 = arith.constant 3 : index
    %c0_7 = arith.constant 0 : index
    %6 = vector.load %arg19[%c3, %c0_7] : memref<20x128xf32, #tpu.memory_space<vmem>>, vector<16x128xf32>
    %c4_8 = arith.constant 4 : index
    %c0_9 = arith.constant 0 : index
    %7 = vector.load %arg19[%c4_8, %c0_9] : memref<20x128xf32, #tpu.memory_space<vmem>>, vector<16x128xf32>
    %8 = tpu.concatenate %6, %7 in 1 : vector<16x128xf32>, vector<16x128xf32> -> vector<16x256xf32>
    %9 = arith.truncf %8 : vector<16x256xf32> to vector<16x256xbf16>
    %c0_10 = arith.constant 0 : index
    %c0_11 = arith.constant 0 : index
    %10 = vector.load %arg2[%c0_10, %c0_11] : memref<256x128xbf16, #tpu.memory_space<vmem>>, vector<256x128xbf16>
    %cst_12 = arith.constant dense<0.000000e+00> : vector<16x128xf32>
    %11 = tpu.matmul %9, %10, %cst_12 {dimension_numbers = #tpu.dot_dimension_numbers<[1], [0], [0], [1], [0, 0, 1, 1], [], []>} : vector<16x256xbf16>, vector<256x128xbf16>, vector<16x128xf32> -> vector<16x128xf32>
    %c0_13 = arith.constant 0 : index
    %c0_14 = arith.constant 0 : index
    %12 = vector.load %arg3[%c0_13, %c0_14] : memref<1x128xf32, #tpu.memory_space<vmem>>, vector<1x128xf32>
    %13 = vector.broadcast %12 : vector<1x128xf32> to vector<16x128xf32>
    %14 = arith.addf %11, %13 : vector<16x128xf32>
    %cst_15 = arith.constant 0.000000e+00 : f32
    %15 = vector.broadcast %cst_15 : f32 to vector<16x128xf32>
    %16 = arith.maximumf %14, %15 : vector<16x128xf32>
    %c4_16 = arith.constant 4 : index
    %c0_17 = arith.constant 0 : index
    %17 = vector.load %arg20[%c4_16, %c0_17] : memref<20x128xf32, #tpu.memory_space<vmem>>, vector<16x128xf32>
    tpu.vector_store %arg20[%c4_16, %c0_17], %16 {strides = array<i32>} : memref<20x128xf32, #tpu.memory_space<vmem>>, vector<16x128xf32>,
    %c3_18 = arith.constant 3 : index
    %c0_19 = arith.constant 0 : index
    %18 = vector.load %arg20[%c3_18, %c0_19] : memref<20x128xf32, #tpu.memory_space<vmem>>, vector<16x128xf32>
    %c4_20 = arith.constant 4 : index
    %c0_21 = arith.constant 0 : index
    %19 = vector.load %arg20[%c4_20, %c0_21] : memref<20x128xf32, #tpu.memory_space<vmem>>, vector<16x128xf32>
    %20 = tpu.concatenate %18, %19 in 1 : vector<16x128xf32>, vector<16x128xf32> -> vector<16x256xf32>
    %21 = arith.truncf %20 : vector<16x256xf32> to vector<16x256xbf16>
    %c0_22 = arith.constant 0 : index
    %c0_23 = arith.constant 0 : index
    %22 = vector.load %arg4[%c0_22, %c0_23] : memref<256x128xbf16, #tpu.memory_space<vmem>>, vector<256x128xbf16>
    %cst_24 = arith.constant dense<0.000000e+00> : vector<16x128xf32>
    %23 = tpu.matmul %21, %22, %cst_24 {dimension_numbers = #tpu.dot_dimension_numbers<[1], [0], [0], [1], [0, 0, 1, 1], [], []>} : vector<16x256xbf16>, vector<256x128xbf16>, vector<16x128xf32> -> vector<16x128xf32>
    %c0_25 = arith.constant 0 : index
    %c0_26 = arith.constant 0 : index
    %24 = vector.load %arg5[%c0_25, %c0_26] : memref<1x128xf32, #tpu.memory_space<vmem>>, vector<1x128xf32>
    %25 = vector.broadcast %24 : vector<1x128xf32> to vector<16x128xf32>
    %26 = arith.addf %23, %25 : vector<16x128xf32>
    %cst_27 = arith.constant 0.000000e+00 : f32
    %27 = vector.broadcast %cst_27 : f32 to vector<16x128xf32>
    %28 = arith.maximumf %26, %27 : vector<16x128xf32>
    %c4_28 = arith.constant 4 : index
    %c0_29 = arith.constant 0 : index
    %29 = vector.load %arg19[%c4_28, %c0_29] : memref<20x128xf32, #tpu.memory_space<vmem>>, vector<16x128xf32>
    %30 = arith.truncf %29 : vector<16x128xf32> to vector<16x128xbf16>
    %c0_30 = arith.constant 0 : index
    %c0_31 = arith.constant 0 : index
    %31 = vector.load %arg6[%c0_30, %c0_31] : memref<128x128xbf16, #tpu.memory_space<vmem>>, vector<128x128xbf16>
    %cst_32 = arith.constant dense<0.000000e+00> : vector<16x128xf32>
    %32 = tpu.matmul %30, %31, %cst_32 {dimension_numbers = #tpu.dot_dimension_numbers<[1], [0], [0], [1], [0, 0, 1, 1], [], []>} : vector<16x128xbf16>, vector<128x128xbf16>, vector<16x128xf32> -> vector<16x128xf32>
    %c0_33 = arith.constant 0 : index
    %c0_34 = arith.constant 0 : index
    %33 = vector.load %arg7[%c0_33, %c0_34] : memref<1x128xf32, #tpu.memory_space<vmem>>, vector<1x128xf32>
    %34 = vector.broadcast %33 : vector<1x128xf32> to vector<16x128xf32>
    %35 = arith.addf %32, %34 : vector<16x128xf32>
    %36 = arith.addf %28, %35 : vector<16x128xf32>
    %cst_35 = arith.constant 0.000000e+00 : f32
    %37 = vector.broadcast %cst_35 : f32 to vector<16x128xf32>
    %38 = arith.maximumf %36, %37 : vector<16x128xf32>
    %c4_36 = arith.constant 4 : index
    %c0_37 = arith.constant 0 : index
    %39 = vector.load %arg19[%c4_36, %c0_37] : memref<20x128xf32, #tpu.memory_space<vmem>>, vector<16x128xf32>
    tpu.vector_store %arg19[%c4_36, %c0_37], %38 {strides = array<i32>} : memref<20x128xf32, #tpu.memory_space<vmem>>, vector<16x128xf32>,
    %c2 = arith.constant 2 : index
    %c0_38 = arith.constant 0 : index
    %40 = vector.load %arg19[%c2, %c0_38] : memref<20x128xf32, #tpu.memory_space<vmem>>, vector<16x128xf32>
    %c4_39 = arith.constant 4 : index
    %c0_40 = arith.constant 0 : index
    %41 = vector.load %arg19[%c4_39, %c0_40] : memref<20x128xf32, #tpu.memory_space<vmem>>, vector<16x128xf32>
    %42 = tpu.concatenate %40, %41 in 1 : vector<16x128xf32>, vector<16x128xf32> -> vector<16x256xf32>
    %43 = arith.truncf %42 : vector<16x256xf32> to vector<16x256xbf16>
    %c0_41 = arith.constant 0 : index
    %c0_42 = arith.constant 0 : index
    %44 = vector.load %arg8[%c0_41, %c0_42] : memref<256x128xbf16, #tpu.memory_space<vmem>>, vector<256x128xbf16>
    %cst_43 = arith.constant dense<0.000000e+00> : vector<16x128xf32>
    %45 = tpu.matmul %43, %44, %cst_43 {dimension_numbers = #tpu.dot_dimension_numbers<[1], [0], [0], [1], [0, 0, 1, 1], [], []>} : vector<16x256xbf16>, vector<256x128xbf16>, vector<16x128xf32> -> vector<16x128xf32>
    %c0_44 = arith.constant 0 : index
    %c0_45 = arith.constant 0 : index
    %46 = vector.load %arg9[%c0_44, %c0_45] : memref<1x128xf32, #tpu.memory_space<vmem>>, vector<1x128xf32>
    %47 = vector.broadcast %46 : vector<1x128xf32> to vector<16x128xf32>
    %48 = arith.addf %45, %47 : vector<16x128xf32>
    %cst_46 = arith.constant 0.000000e+00 : f32
    %49 = vector.broadcast %cst_46 : f32 to vector<16x128xf32>
    %50 = arith.maximumf %48, %49 : vector<16x128xf32>
    %c4_47 = arith.constant 4 : index
    %c0_48 = arith.constant 0 : index
    %51 = vector.load %arg20[%c4_47, %c0_48] : memref<20x128xf32, #tpu.memory_space<vmem>>, vector<16x128xf32>
    tpu.vector_store %arg20[%c4_47, %c0_48], %50 {strides = array<i32>} : memref<20x128xf32, #tpu.memory_space<vmem>>, vector<16x128xf32>,
    %c2_49 = arith.constant 2 : index
    %c0_50 = arith.constant 0 : index
    %52 = vector.load %arg20[%c2_49, %c0_50] : memref<20x128xf32, #tpu.memory_space<vmem>>, vector<16x128xf32>
    %c4_51 = arith.constant 4 : index
    %c0_52 = arith.constant 0 : index
    %53 = vector.load %arg20[%c4_51, %c0_52] : memref<20x128xf32, #tpu.memory_space<vmem>>, vector<16x128xf32>
    %54 = tpu.concatenate %52, %53 in 1 : vector<16x128xf32>, vector<16x128xf32> -> vector<16x256xf32>
    %55 = arith.truncf %54 : vector<16x256xf32> to vector<16x256xbf16>
    %c0_53 = arith.constant 0 : index
    %c0_54 = arith.constant 0 : index
    %56 = vector.load %arg10[%c0_53, %c0_54] : memref<256x128xbf16, #tpu.memory_space<vmem>>, vector<256x128xbf16>
    %cst_55 = arith.constant dense<0.000000e+00> : vector<16x128xf32>
    %57 = tpu.matmul %55, %56, %cst_55 {dimension_numbers = #tpu.dot_dimension_numbers<[1], [0], [0], [1], [0, 0, 1, 1], [], []>} : vector<16x256xbf16>, vector<256x128xbf16>, vector<16x128xf32> -> vector<16x128xf32>
    %c0_56 = arith.constant 0 : index
    %c0_57 = arith.constant 0 : index
    %58 = vector.load %arg11[%c0_56, %c0_57] : memref<1x128xf32, #tpu.memory_space<vmem>>, vector<1x128xf32>
    %59 = vector.broadcast %58 : vector<1x128xf32> to vector<16x128xf32>
    %60 = arith.addf %57, %59 : vector<16x128xf32>
    %cst_58 = arith.constant 0.000000e+00 : f32
    %61 = vector.broadcast %cst_58 : f32 to vector<16x128xf32>
    %62 = arith.maximumf %60, %61 : vector<16x128xf32>
    %c4_59 = arith.constant 4 : index
    %c0_60 = arith.constant 0 : index
    %63 = vector.load %arg19[%c4_59, %c0_60] : memref<20x128xf32, #tpu.memory_space<vmem>>, vector<16x128xf32>
    %64 = arith.addf %62, %63 : vector<16x128xf32>
    %cst_61 = arith.constant 0.000000e+00 : f32
    %65 = vector.broadcast %cst_61 : f32 to vector<16x128xf32>
    %66 = arith.maximumf %64, %65 : vector<16x128xf32>
    %c4_62 = arith.constant 4 : index
    %c0_63 = arith.constant 0 : index
    %67 = vector.load %arg19[%c4_62, %c0_63] : memref<20x128xf32, #tpu.memory_space<vmem>>, vector<16x128xf32>
    tpu.vector_store %arg19[%c4_62, %c0_63], %66 {strides = array<i32>} : memref<20x128xf32, #tpu.memory_space<vmem>>, vector<16x128xf32>,
    %c0_64 = arith.constant 0 : index
    %c0_65 = arith.constant 0 : index
    %68 = vector.load %arg19[%c0_64, %c0_65] : memref<20x128xf32, #tpu.memory_space<vmem>>, vector<16x128xf32>
    %c4_66 = arith.constant 4 : index
    %c0_67 = arith.constant 0 : index
    %69 = vector.load %arg19[%c4_66, %c0_67] : memref<20x128xf32, #tpu.memory_space<vmem>>, vector<16x128xf32>
    %70 = tpu.concatenate %68, %69 in 1 : vector<16x128xf32>, vector<16x128xf32> -> vector<16x256xf32>
    %71 = arith.truncf %70 : vector<16x256xf32> to vector<16x256xbf16>
    %c0_68 = arith.constant 0 : index
    %c0_69 = arith.constant 0 : index
    %72 = vector.load %arg12[%c0_68, %c0_69] : memref<256x128xbf16, #tpu.memory_space<vmem>>, vector<256x128xbf16>
    %cst_70 = arith.constant dense<0.000000e+00> : vector<16x128xf32>
    %73 = tpu.matmul %71, %72, %cst_70 {dimension_numbers = #tpu.dot_dimension_numbers<[1], [0], [0], [1], [0, 0, 1, 1], [], []>} : vector<16x256xbf16>, vector<256x128xbf16>, vector<16x128xf32> -> vector<16x128xf32>
    %c0_71 = arith.constant 0 : index
    %c0_72 = arith.constant 0 : index
    %74 = vector.load %arg13[%c0_71, %c0_72] : memref<1x128xf32, #tpu.memory_space<vmem>>, vector<1x128xf32>
    %75 = vector.broadcast %74 : vector<1x128xf32> to vector<16x128xf32>
    %76 = arith.addf %73, %75 : vector<16x128xf32>
    %cst_73 = arith.constant 0.000000e+00 : f32
    %77 = vector.broadcast %cst_73 : f32 to vector<16x128xf32>
    %78 = arith.maximumf %76, %77 : vector<16x128xf32>
    %c4_74 = arith.constant 4 : index
    %c0_75 = arith.constant 0 : index
    %79 = vector.load %arg20[%c4_74, %c0_75] : memref<20x128xf32, #tpu.memory_space<vmem>>, vector<16x128xf32>
    tpu.vector_store %arg20[%c4_74, %c0_75], %78 {strides = array<i32>} : memref<20x128xf32, #tpu.memory_space<vmem>>, vector<16x128xf32>,
    %c0_76 = arith.constant 0 : index
    %c0_77 = arith.constant 0 : index
    %80 = vector.load %arg20[%c0_76, %c0_77] : memref<20x128xf32, #tpu.memory_space<vmem>>, vector<16x128xf32>
    %c4_78 = arith.constant 4 : index
    %c0_79 = arith.constant 0 : index
    %81 = vector.load %arg20[%c4_78, %c0_79] : memref<20x128xf32, #tpu.memory_space<vmem>>, vector<16x128xf32>
    %82 = tpu.concatenate %80, %81 in 1 : vector<16x128xf32>, vector<16x128xf32> -> vector<16x256xf32>
    %83 = arith.truncf %82 : vector<16x256xf32> to vector<16x256xbf16>
    %c0_80 = arith.constant 0 : index
    %c0_81 = arith.constant 0 : index
    %84 = vector.load %arg14[%c0_80, %c0_81] : memref<256x128xbf16, #tpu.memory_space<vmem>>, vector<256x128xbf16>
    %cst_82 = arith.constant dense<0.000000e+00> : vector<16x128xf32>
    %85 = tpu.matmul %83, %84, %cst_82 {dimension_numbers = #tpu.dot_dimension_numbers<[1], [0], [0], [1], [0, 0, 1, 1], [], []>} : vector<16x256xbf16>, vector<256x128xbf16>, vector<16x128xf32> -> vector<16x128xf32>
    %c0_83 = arith.constant 0 : index
    %c0_84 = arith.constant 0 : index
    %86 = vector.load %arg15[%c0_83, %c0_84] : memref<1x128xf32, #tpu.memory_space<vmem>>, vector<1x128xf32>
    %87 = vector.broadcast %86 : vector<1x128xf32> to vector<16x128xf32>
    %88 = arith.addf %85, %87 : vector<16x128xf32>
    %cst_85 = arith.constant 0.000000e+00 : f32
    %89 = vector.broadcast %cst_85 : f32 to vector<16x128xf32>
    %90 = arith.maximumf %88, %89 : vector<16x128xf32>
    %c4_86 = arith.constant 4 : index
    %c0_87 = arith.constant 0 : index
    %91 = vector.load %arg19[%c4_86, %c0_87] : memref<20x128xf32, #tpu.memory_space<vmem>>, vector<16x128xf32>
    %92 = arith.truncf %91 : vector<16x128xf32> to vector<16x128xbf16>
    %c0_88 = arith.constant 0 : index
    %c0_89 = arith.constant 0 : index
    %93 = vector.load %arg16[%c0_88, %c0_89] : memref<128x128xbf16, #tpu.memory_space<vmem>>, vector<128x128xbf16>
    %cst_90 = arith.constant dense<0.000000e+00> : vector<16x128xf32>
    %94 = tpu.matmul %92, %93, %cst_90 {dimension_numbers = #tpu.dot_dimension_numbers<[1], [0], [0], [1], [0, 0, 1, 1], [], []>} : vector<16x128xbf16>, vector<128x128xbf16>, vector<16x128xf32> -> vector<16x128xf32>
    %c0_91 = arith.constant 0 : index
    %c0_92 = arith.constant 0 : index
    %95 = vector.load %arg17[%c0_91, %c0_92] : memref<1x128xf32, #tpu.memory_space<vmem>>, vector<1x128xf32>
    %96 = vector.broadcast %95 : vector<1x128xf32> to vector<16x128xf32>
    %97 = arith.addf %94, %96 : vector<16x128xf32>
    %98 = arith.addf %90, %97 : vector<16x128xf32>
    %cst_93 = arith.constant 0.000000e+00 : f32
    %99 = vector.broadcast %cst_93 : f32 to vector<16x128xf32>
    %100 = arith.maximumf %98, %99 : vector<16x128xf32>
    %c0_94 = arith.constant 0 : index
    %c0_95 = arith.constant 0 : index
    %c0_96 = arith.constant 0 : index
    %101 = vector.load %arg18[%c0_94, %c0_95, %c0_96] : memref<1x16x128xf32, #tpu.memory_space<vmem>>, vector<1x16x128xf32>
    %102 = vector.shape_cast %101 : vector<1x16x128xf32> to vector<16x128xf32>
    %103 = vector.shape_cast %100 : vector<16x128xf32> to vector<1x16x128xf32>
    tpu.vector_store %arg18[%c0_94, %c0_95, %c0_96], %103 {strides = array<i32>} : memref<1x16x128xf32, #tpu.memory_space<vmem>>, vector<1x16x128xf32>,
    return
  }
  func.func @transform_0(%arg0: i32) -> (i32, i32, i32) {
    %c0_i32 = arith.constant 0 : i32
    %c0_i32_0 = arith.constant 0 : i32
    %c0_i32_1 = arith.constant 0 : i32
    return %arg0, %c0_i32, %c0_i32_0 : i32, i32, i32
  }
  func.func @transform_1(%arg0: i32) -> (i32, i32) {
    %c0_i32 = arith.constant 0 : i32
    %c0_i32_0 = arith.constant 0 : i32
    %c0_i32_1 = arith.constant 0 : i32
    return %c0_i32, %c0_i32_0 : i32, i32
  }
  func.func @transform_2(%arg0: i32) -> (i32, i32) {
    %c0_i32 = arith.constant 0 : i32
    %c0_i32_0 = arith.constant 0 : i32
    %c0_i32_1 = arith.constant 0 : i32
    return %c0_i32, %c0_i32_0 : i32, i32
  }
  func.func @transform_3(%arg0: i32) -> (i32, i32) {
    %c0_i32 = arith.constant 0 : i32
    %c0_i32_0 = arith.constant 0 : i32
    %c0_i32_1 = arith.constant 0 : i32
    return %c0_i32, %c0_i32_0 : i32, i32
  }
  func.func @transform_4(%arg0: i32) -> (i32, i32) {
    %c0_i32 = arith.constant 0 : i32
    %c0_i32_0 = arith.constant 0 : i32
    %c0_i32_1 = arith.constant 0 : i32
    return %c0_i32, %c0_i32_0 : i32, i32
  }
  func.func @transform_5(%arg0: i32) -> (i32, i32) {
    %c0_i32 = arith.constant 0 : i32
    %c0_i32_0 = arith.constant 0 : i32
    %c0_i32_1 = arith.constant 0 : i32
    return %c0_i32, %c0_i32_0 : i32, i32
  }
  func.func @transform_6(%arg0: i32) -> (i32, i32) {
    %c0_i32 = arith.constant 0 : i32
    %c0_i32_0 = arith.constant 0 : i32
    %c0_i32_1 = arith.constant 0 : i32
    return %c0_i32, %c0_i32_0 : i32, i32
  }
  func.func @transform_7(%arg0: i32) -> (i32, i32) {
    %c0_i32 = arith.constant 0 : i32
    %c0_i32_0 = arith.constant 0 : i32
    %c0_i32_1 = arith.constant 0 : i32
    return %c0_i32, %c0_i32_0 : i32, i32
  }
  func.func @transform_8(%arg0: i32) -> (i32, i32) {
    %c0_i32 = arith.constant 0 : i32
    %c0_i32_0 = arith.constant 0 : i32
    %c0_i32_1 = arith.constant 0 : i32
    return %c0_i32, %c0_i32_0 : i32, i32
  }
  func.func @transform_9(%arg0: i32) -> (i32, i32) {
    %c0_i32 = arith.constant 0 : i32
    %c0_i32_0 = arith.constant 0 : i32
    %c0_i32_1 = arith.constant 0 : i32
    return %c0_i32, %c0_i32_0 : i32, i32
  }
  func.func @transform_10(%arg0: i32) -> (i32, i32) {
    %c0_i32 = arith.constant 0 : i32
    %c0_i32_0 = arith.constant 0 : i32
    %c0_i32_1 = arith.constant 0 : i32
    return %c0_i32, %c0_i32_0 : i32, i32
  }
  func.func @transform_11(%arg0: i32) -> (i32, i32) {
    %c0_i32 = arith.constant 0 : i32
    %c0_i32_0 = arith.constant 0 : i32
    %c0_i32_1 = arith.constant 0 : i32
    return %c0_i32, %c0_i32_0 : i32, i32
  }
  func.func @transform_12(%arg0: i32) -> (i32, i32) {
    %c0_i32 = arith.constant 0 : i32
    %c0_i32_0 = arith.constant 0 : i32
    %c0_i32_1 = arith.constant 0 : i32
    return %c0_i32, %c0_i32_0 : i32, i32
  }
  func.func @transform_13(%arg0: i32) -> (i32, i32) {
    %c0_i32 = arith.constant 0 : i32
    %c0_i32_0 = arith.constant 0 : i32
    %c0_i32_1 = arith.constant 0 : i32
    return %c0_i32, %c0_i32_0 : i32, i32
  }
  func.func @transform_14(%arg0: i32) -> (i32, i32) {
    %c0_i32 = arith.constant 0 : i32
    %c0_i32_0 = arith.constant 0 : i32
    %c0_i32_1 = arith.constant 0 : i32
    return %c0_i32, %c0_i32_0 : i32, i32
  }
  func.func @transform_15(%arg0: i32) -> (i32, i32) {
    %c0_i32 = arith.constant 0 : i32
    %c0_i32_0 = arith.constant 0 : i32
    %c0_i32_1 = arith.constant 0 : i32
    return %c0_i32, %c0_i32_0 : i32, i32
  }
  func.func @transform_16(%arg0: i32) -> (i32, i32) {
    %c0_i32 = arith.constant 0 : i32
    %c0_i32_0 = arith.constant 0 : i32
    %c0_i32_1 = arith.constant 0 : i32
    return %c0_i32, %c0_i32_0 : i32, i32
  }
  func.func @transform_17(%arg0: i32) -> (i32, i32, i32) {
    %c0_i32 = arith.constant 0 : i32
    %c0_i32_0 = arith.constant 0 : i32
    %c0_i32_1 = arith.constant 0 : i32
    return %arg0, %c0_i32, %c0_i32_0 : i32, i32, i32
  }
}

</mosaic_0001>

<bundles_post_ra>
// kernel: tpu_custom_call.1
= control target key start
LH: loop header
LB: loop body
LE: loop exit
PB: predicated region body
PF: predicated region fallthrough
CT: control target
= control target key end

     0   :  { %s3582_s0 = inlined_call_operand.hbm [shape: f32[2,16,128], index: 0, kind: input, shape index: {}]   ;;  %s3583_s1 = inlined_call_operand.hbm [shape: bf16[256,128], index: 1, kind: input, shape index: {}]   ;;  %s3584_s2 = inlined_call_operand.vmem [shape: f32[1,128], index: 2, kind: input, shape index: {}]   ;;  %s3585_s3 = inlined_call_operand.hbm [shape: bf16[256,128], index: 3, kind: input, shape index: {}]   ;;  %s3586_s4 = inlined_call_operand.vmem [shape: f32[1,128], index: 4, kind: input, shape index: {}]   ;;  %s3587_s5 = inlined_call_operand.hbm [shape: bf16[128,128], index: 5, kind: input, shape index: {}]   ;;  %s3588_s6 = inlined_call_operand.vmem [shape: f32[1,128], index: 6, kind: input, shape index: {}]   ;;  %s3589_s7 = inlined_call_operand.hbm [shape: bf16[256,128], index: 7, kind: input, shape index: {}]   ;;  %s3590_s8 = inlined_call_operand.vmem [shape: f32[1,128], index: 8, kind: input, shape index: {}]   ;;  %s3591_s9 = inlined_call_operand.hbm [shape: bf16[256,128], index: 9, kind: input, shape index: {}]   ;;  %s3592_s10 = inlined_call_operand.vmem [shape: f32[1,128], index: 10, kind: input, shape index: {}]   ;;  %s3593_s11 = inlined_call_operand.hbm [shape: bf16[256,128], index: 11, kind: input, shape index: {}]   ;;  %s3594_s12 = inlined_call_operand.vmem [shape: f32[1,128], index: 12, kind: input, shape index: {}]   ;;  %s3595_s13 = inlined_call_operand.hbm [shape: bf16[256,128], index: 13, kind: input, shape index: {}]   ;;  %s3596_s14 = inlined_call_operand.vmem [shape: f32[1,128], index: 14, kind: input, shape index: {}]   ;;  %s3597_s15 = inlined_call_operand.hbm [shape: bf16[128,128], index: 15, kind: input, shape index: {}]   ;;  %s3598_s16 = inlined_call_operand.vmem [shape: f32[1,128], index: 16, kind: input, shape index: {}]   ;;  %s3599_s17 = inlined_call_operand.hbm [shape: f32[2,16,128], index: 17, kind: output, shape index: {}]  }
   0x1   :  { %3606 = sst [smem:[#allocation26_spill]] %s3582_s0 }
   0x2   :  { %3607 = sst [smem:[#allocation27_spill]] %s3583_s1 }
   0x3   :  { %3608 = sst [smem:[#allocation28_spill]] %s3585_s3 }
   0x4   :  { %3609 = sst [smem:[#allocation29_spill]] %s3587_s5 }
   0x5   :  { %3610 = sst [smem:[#allocation30_spill]] %s3589_s7 }
   0x6   :  { %3611 = sst [smem:[#allocation31_spill]] %s3591_s9 }
   0x7   :  { %3612 = sst [smem:[#allocation32_spill]] %s3593_s11 }
   0x8   :  { %3613 = sst [smem:[#allocation33_spill]] %s3595_s13 }
   0x9   :  { %3614 = sst [smem:[#allocation34_spill]] %s3596_s14 }
   0xa   :  { %3615 = sst [smem:[#allocation35_spill]] %s3597_s15 }
   0xb   :  { %3616 = sst [smem:[#allocation36_spill]] %s3598_s16 }
   0xc   :  { %3617 = sst [smem:[#allocation37_spill]] %s3599_s17 }
   0xd   :  { %22 = vsyncpa [#allocation5], 0 }
   0xe   :  { %24 = vsyncpa [#allocation5 + $0x1], 0 }
   0xf   :  { %25 = vsyncpa [#allocation8], 0 }
  0x10   :  { %26 = vsyncpa [#allocation11], 0 }
  0x11   :  { %27 = vsyncpa [#allocation14], 0 }
  0x12   :  { %28 = vsyncpa [#allocation17], 0 }
  0x13   :  { %29 = vsyncpa [#allocation6], 0 }
  0x14   :  { %31 = vsyncpa [#allocation6 + $0x1], 0  ;;  %s3228_s24 = smov 0   ;;  %s3230_s25 = smov 0  }
  0x15   :  { %s3232_s26 = smov 0   ;;  %s3234_s27 = smov 0  }
  0x16 LB: > { %s3120_s28 = smov [#allocation7]   ;;  %s3249_s0 = sadd.s32 4294967295, %s3118_s27   ;;  %s3118_s27 = sphi %s3234_s27, %s3654_s27   ;;  %s3114_s26 = sphi %s3232_s26, %s3653_s26   ;;  %s3110_s25 = sphi %s3230_s25, %s3652_s25   ;;  %s3106_s24 = sphi %s3228_s24, %s3651_s24  }
  0x17   : > { %s442_s29 = sshll.u32 %s3120_s28, 4  ;;  %p2214_p0 = scmp.ge.s32.totalorder %s3118_s27, 1  ;;  %s443_s29 = int_to_ptr.vmem [resolvable:$true] %s442_s29 }
  0x18   : > { %p3602_p1 = scmp.eq.s32.totalorder %s3249_s0, 0  ;;  %p430_p2 = scmp.lt.s32.totalorder %s3118_s27, 3 }
  0x19   : > { %s3121_s18 = smov [#allocation10]   ;;  %s3122_s20 = smov [#allocation13]  }
  0x1a   : > { %p3254_p3 = pnand %p2214_p0, %p430_p2  ;;  %s474_s19 = sshll.u32 %s3121_s18, 4  ;;  %s3267_s19 = int_to_ptr.vmem [resolvable:$true] %s474_s19 }
  0x1b   : > { %s506_s21 = sshll.u32 %s3122_s20, 4  ;;  %s2813_s23 = scalar_lea.vmem %s443_s29, 2048  ;;  %s3269_s21 = int_to_ptr.vmem [resolvable:$true] %s506_s21 }
  0x1c   : > { %s3618_s30 = scalar_select %p3254_p3, 1, 0 }
  0x1d   : > { %p2591_p5 = pneg %p3254_p3  ;;  %p2814_p8 = scmp.ne.s32.totalorder %s443_s29, %s2813_s23 }
  0x1e   : > { %p2821_p11 = scmp.lt.s32.totalorder %s443_s29, %s443_s29  ;;  %p2822_p12 = scmp.lt.s32.totalorder %s2813_s23, %s2813_s23 }
  0x1f   : > { %p3263_p6 = pnand %p2591_p5, %p3602_p1 }
  0x20   : > { %p2823_p13 = por %p2822_p12, %p2821_p11 }
  0x21   : > { %p3273_p7 = pneg %p3263_p6 }
  0x23   : > { %p2816_p9 = pnand %p2814_p8, %p3273_p7 }
  0x25   : > { %p2817_p10 = pneg %p2816_p9 }
  0x27   : > { %p2824_p0 = pnand %p2823_p13, %p2817_p10 }
  0x29   : > { %2827 = shalt.err (!%p2824_p0)
}
  0x2a   : > { %s3123_s28 = smov 64   ;;  %s3124_s18 = smov 4  }
  0x2b   : > { %s3621_s16 = sld [smem:[#allocation27_spill]]  ;;  %s2839_s14 = scalar_lea.vmem %s3267_s19, 1024 }
  0x2c   : > { %p2840_p2 = scmp.ne.s32.totalorder %s3267_s19, %s2839_s14  ;;  %p2847_p9 = scmp.lt.s32.totalorder %s3267_s19, %s3267_s19 }
  0x2d   : > { %p2848_p10 = scmp.lt.s32.totalorder %s2839_s14, %s2839_s14 }
  0x2e   : > { %p2842_p5 = pnand %p2840_p2, %p3273_p7 }
  0x2f   : > { %p2849_p11 = por %p2848_p10, %p2847_p9 }
  0x30   : > { %p2843_p8 = pneg %p2842_p5 }
  0x31   : > { %2594 = dma.hbm_to_vmem [thread:$0]  (!%p3263_p6), %s3621_s16, 2048, %s443_s29, [#allocation8], %s3123_s28, %s3123_s28, %s3124_s18  }
  0x32   : > { %p2850_p12 = pnand %p2849_p11, %p2843_p8 }
  0x34   : > { %2853 = shalt.err (!%p2850_p12)
}
  0x35   : > { %s3622_s5 = sld [smem:[#allocation29_spill]]  ;;  %s2865_s16 = scalar_lea.vmem %s3269_s21, 2048 }
  0x36   : > { %p2866_p13 = scmp.ne.s32.totalorder %s3269_s21, %s2865_s16  ;;  %p2873_p5 = scmp.lt.s32.totalorder %s3269_s21, %s3269_s21 }
  0x37   : > { %p2874_p8 = scmp.lt.s32.totalorder %s2865_s16, %s2865_s16 }
  0x38   : > { %p2868_p0 = pnand %p2866_p13, %p3273_p7 }
  0x39   : > { %p2875_p9 = por %p2874_p8, %p2873_p5 }
  0x3a   : > { %p2869_p2 = pneg %p2868_p0 }
  0x3b   : > { %2600 = dma.hbm_to_vmem [thread:$0]  (!%p3263_p6), %s3622_s5, 1024, %s3267_s19, [#allocation11], %s3123_s28, %s3123_s28, %s3124_s18  }
  0x3c   : > { %p2876_p10 = pnand %p2875_p9, %p2869_p2 }
  0x3e   : > { %2879 = shalt.err (!%p2876_p10)
}
  0x3f   : > { %s3623_s9 = sld [smem:[#allocation31_spill]]  ;;  %s3125_s19 = smov [#allocation16]  }
  0x40   : > { %s538_s20 = sshll.u32 %s3125_s19, 4  ;;  %s3126_s23 = smov [#allocation9]   ;;  %s539_s20 = int_to_ptr.vmem [resolvable:$true] %s538_s20 }
  0x41   : > { %s458_s17 = sshll.u32 %s3126_s23, 4  ;;  %s2891_s16 = scalar_lea.vmem %s539_s20, 2048  ;;  %s459_s17 = int_to_ptr.vmem [resolvable:$true] %s458_s17 }
  0x42   : > { %p2892_p11 = scmp.ne.s32.totalorder %s539_s20, %s2891_s16  ;;  %p2899_p0 = scmp.lt.s32.totalorder %s539_s20, %s539_s20 }
  0x43   : > { %p2900_p2 = scmp.lt.s32.totalorder %s2891_s16, %s2891_s16 }
  0x44   : > { %p2894_p12 = pnand %p2892_p11, %p3273_p7 }
  0x45   : > { %2606 = dma.hbm_to_vmem [thread:$0]  (!%p3263_p6), %s3623_s9, 2048, %s3269_s21, [#allocation14], %s3123_s28, %s3123_s28, %s3124_s18  }
  0x46   : > { %p2895_p13 = pneg %p2894_p12  ;;  %p2901_p5 = por %p2900_p2, %p2899_p0 }
  0x48   : > { %p2902_p8 = pnand %p2901_p5, %p2895_p13 }
  0x4a   : > { %2905 = shalt.err (!%p2902_p8)
}
  0x4b   : > { %s3624_s13 = sld [smem:[#allocation33_spill]]  ;;  %s2917_s29 = scalar_lea.vmem %s459_s17, 2048 }
  0x4c   : > { %p2918_p9 = scmp.ne.s32.totalorder %s459_s17, %s2917_s29  ;;  %p2925_p12 = scmp.lt.s32.totalorder %s459_s17, %s459_s17 }
  0x4d   : > { %p2926_p0 = scmp.lt.s32.totalorder %s2917_s29, %s2917_s29 }
  0x4e   : > { %p2920_p10 = pnand %p2918_p9, %p3273_p7 }
  0x4f   : > { %p2927_p13 = por %p2926_p0, %p2925_p12 }
  0x50   : > { %p2921_p11 = pneg %p2920_p10 }
  0x51   : > { %2612 = dma.hbm_to_vmem [thread:$0]  (!%p3263_p6), %s3624_s13, 2048, %s539_s20, [#allocation17], %s3123_s28, %s3123_s28, %s3124_s18  }
  0x52   : > { %p2928_p2 = pnand %p2927_p13, %p2921_p11 }
  0x54   : > { %2931 = shalt.err (!%p2928_p2)
}
  0x55   : > { %s3625_s3 = sld [smem:[#allocation28_spill]]  ;;  %s3127_s20 = smov [#allocation12]  }
  0x56   : > { %s490_s16 = sshll.u32 %s3127_s20, 4  ;;  %s3128_s21 = smov [#allocation15]   ;;  %s491_s16 = int_to_ptr.vmem [resolvable:$true] %s490_s16 }
  0x57   : > { %s522_s14 = sshll.u32 %s3128_s21, 4  ;;  %s2943_s5 = scalar_lea.vmem %s491_s16, 2048  ;;  %s523_s14 = int_to_ptr.vmem [resolvable:$true] %s522_s14 }
  0x58   : > { %p2944_p5 = scmp.ne.s32.totalorder %s491_s16, %s2943_s5  ;;  %p2951_p10 = scmp.lt.s32.totalorder %s491_s16, %s491_s16 }
  0x59   : > { %p2952_p11 = scmp.lt.s32.totalorder %s2943_s5, %s2943_s5 }
  0x5a   : > { %p2946_p8 = pnand %p2944_p5, %p3273_p7 }
  0x5b   : > { %2597 = dma.hbm_to_vmem [thread:$0]  (!%p3263_p6), %s3625_s3, 2048, %s459_s17, [#allocation8], %s3123_s28, %s3123_s28, %s3124_s18  }
  0x5c   : > { %p2947_p9 = pneg %p2946_p8  ;;  %p2953_p12 = por %p2952_p11, %p2951_p10 }
  0x5e   : > { %p2954_p0 = pnand %p2953_p12, %p2947_p9 }
  0x60   : > { %2957 = shalt.err (!%p2954_p0)
}
  0x61   : > { %s3626_s7 = sld [smem:[#allocation30_spill]]  ;;  %s2969_s19 = scalar_lea.vmem %s523_s14, 2048 }
  0x62   : > { %p2970_p13 = scmp.ne.s32.totalorder %s523_s14, %s2969_s19  ;;  %p2977_p8 = scmp.lt.s32.totalorder %s523_s14, %s523_s14 }
  0x63   : > { %p2978_p10 = scmp.lt.s32.totalorder %s2969_s19, %s2969_s19 }
  0x64   : > { %p2972_p2 = pnand %p2970_p13, %p3273_p7 }
  0x65   : > { %p2979_p9 = por %p2978_p10, %p2977_p8 }
  0x66   : > { %p2973_p5 = pneg %p2972_p2 }
  0x67   : > { %2603 = dma.hbm_to_vmem [thread:$0]  (!%p3263_p6), %s3626_s7, 2048, %s491_s16, [#allocation11], %s3123_s28, %s3123_s28, %s3124_s18  }
  0x68   : > { %p2980_p11 = pnand %p2979_p9, %p2973_p5 }
  0x6a   : > { %2983 = shalt.err (!%p2980_p11)
}
  0x6b   : > { %s3627_s11 = sld [smem:[#allocation32_spill]]  ;;  %s3129_s20 = smov [#allocation18]  }
  0x6c   : > { %s554_s16 = sshll.u32 %s3129_s20, 4  ;;  %s555_s16 = int_to_ptr.vmem [resolvable:$true] %s554_s16 }
  0x6d   : > { %s2995_s21 = scalar_lea.vmem %s555_s16, 1024  ;;  %p3003_p2 = scmp.lt.s32.totalorder %s555_s16, %s555_s16 }
  0x6e   : > { %p2996_p12 = scmp.ne.s32.totalorder %s555_s16, %s2995_s21  ;;  %p3004_p5 = scmp.lt.s32.totalorder %s2995_s21, %s2995_s21 }
  0x70   : > { %p2998_p0 = pnand %p2996_p12, %p3273_p7  ;;  %p3005_p8 = por %p3004_p5, %p3003_p2 }
  0x71   : > { %2609 = dma.hbm_to_vmem [thread:$0]  (!%p3263_p6), %s3627_s11, 2048, %s523_s14, [#allocation14], %s3123_s28, %s3123_s28, %s3124_s18  }
  0x72   : > { %p2999_p13 = pneg %p2998_p0 }
  0x74   : > { %p3006_p10 = pnand %p3005_p8, %p2999_p13 }
  0x76   : > { %3009 = shalt.err (!%p3006_p10)
}
  0x77   : > { %s3628_s15 = sld [smem:[#allocation35_spill]]  ;;  %s2213_s1 = sadd.s32 4294967294, %s3118_s27  }
  0x78   : > { %s3369_s22 = sadd.s32 1, %s3118_s27   ;;  %s44_s19 = sadd.s32 1, %s3114_s26 }
  0x79   : > { %s41_s29 = ssub.s32 %s3118_s27, %s3369_s22  ;;  %p51_p9 = scmp.ne.s32.totalorder %s3114_s26, %s3110_s25 }
  0x7a   : > { %p42_p7 = scmp.eq.s32.totalorder %s41_s29, 0  ;;  %p52_p11 = scmp.eq.s32.totalorder %s3118_s27, 0 }
  0x7b   : > { %p57_p12 = scmp.ne.s32.totalorder %s3110_s25, %s3106_s24  ;;  %p417_p13 = scmp.eq.s32.totalorder %s3249_s0, 1 }
  0x7c   : > { %s3380_s5 = scalar_select %p42_p7, %s3114_s26, %s44_s19  }
  0x7d   : > { %2615 = dma.hbm_to_vmem [thread:$0]  (!%p3263_p6), %s3628_s15, 1024, %s555_s16, [#allocation17], %s3123_s28, %s3123_s28, %s3124_s18  }
  0x7e   : > { %p3382_p0 = por %p52_p11, %p51_p9  ;;  %p3388_p6 = por %p3602_p1, %p57_p12 }
  0x7f   : > { %p423_p2 = scmp.eq.s32.totalorder %s2213_s1, 1  ;;  %p2632_p5 = scmp.lt.s32.totalorder %s3118_s27, 2 }
  0x80   : > { %s3630_s28 = scalar_select %p3388_p6, 1, 0 }
  0x81   : > { %s571_s18 = sand.u32 1, %s3114_s26   ;;  %p3395_p8 = por %p417_p13, %p51_p9 }
  0x82   : > { %p3399_p10 = por %p423_p2, %p57_p12  ;;  %s2224_s21 = sshll.u32 %s571_s18, 4 }
  0x83   : > { %s3631_s20 = scalar_select %p3395_p8, 1, 0 }
  0x84   : > { %s3632_s16 = scalar_select %p3399_p10, 1, 0 }
  0x85   : > { %s2363_s17 = sshll.u32 %s3118_s27, 8  ;;  %s3633_s19 = sld [smem:[#allocation26_spill]] }
  0x86   : > { %s575_s1 = scalar_lea.vmem [#allocation4], %s2224_s21  ;;  %p3413_p7 = pnand %p2632_p5, %p3382_p0 }
  0x87   : > { %s582_s7 = sshll.u32 %s575_s1, 4  ;;  %s3417_s11 = scalar_lea.sflag [#allocation5], %s571_s18  ;;  %s3409_s7 = int_to_ptr.vmem [resolvable:$true] %s582_s7 }
  0x88   : > { %p3012_p11 = pneg %p3413_p7 }
  0x8b   : > { %s3407_s3 = scalar_lea.hbm %s3633_s19, %s2363_s17  ;;  %s3015_s21 = scalar_lea.hbm %s3633_s19, 512 }
  0x8c   : > { %s3010_s13 = scalar_lea.hbm %s3407_s3, 256  ;;  %p3016_p0 = scmp.lt.s32.totalorder %s3407_s3, %s3633_s19 }
  0x8d   : > { %p3011_p9 = scmp.ne.s32.totalorder %s3407_s3, %s3010_s13  ;;  %p3017_p2 = scmp.lt.s32.totalorder %s3015_s21, %s3010_s13 }
  0x8f   : > { %p3013_p12 = pnand %p3012_p11, %p3011_p9  ;;  %p3018_p5 = por %p3017_p2, %p3016_p0 }
  0x91   : > { %p3014_p13 = pneg %p3013_p12 }
  0x93   : > { %p3019_p4 = pnand %p3018_p5, %p3014_p13 }
  0x95   : > { %3022 = shalt.err (!%p3019_p4)
}
  0x96   : > { %s3023_s23 = scalar_lea.vmem %s3409_s7, 256  ;;  %s3130_s18 = smov [#allocation4]  }
  0x97   : > { %p3024_p1 = scmp.ne.s32.totalorder %s3409_s7, %s3023_s23  ;;  %s3028_s15 = sshll.u32 %s3130_s18, 4  ;;  %s3029_s15 = int_to_ptr.vmem [resolvable:$false] %s3028_s15 }
  0x98   : > { %s3030_s17 = scalar_lea.vmem %s3029_s15, 512  ;;  %p3031_p12 = scmp.lt.s32.totalorder %s3409_s7, %s3029_s15 }
  0x99   : > { %p3026_p10 = pnand %p3024_p1, %p3012_p11  ;;  %p3032_p8 = scmp.lt.s32.totalorder %s3030_s17, %s3023_s23 }
  0x9b   : > { %p3027_p9 = pneg %p3026_p10  ;;  %p3033_p6 = por %p3032_p8, %p3031_p12 }
  0x9d   : > { %p3034_p3 = pnand %p3033_p6, %p3027_p9 }
  0x9f   : > { %3037 = shalt.err (!%p3034_p3)
}
  0xa0   : > { %s3131_s13 = smov 128   ;;  %s3132_s14 = smov 8  }
  0xa1   : > { %2619 = dma.hbm_to_vmem [thread:$0]  (!%p3413_p7), %s3407_s3, 256, %s3409_s7, %s3417_s11, %s3131_s13, %s3131_s13, %s3132_s14  }
  0xa2   : > { %p3635_p1 = scmp.ne.s32.totalorder %s3618_s30, 0 }
  0xa3   : > { %s3441_s21 = sand.u32 (!%p3635_p1), 1, %s3110_s25   ;;  %p3636_p3 = scmp.ne.s32.totalorder (!%p3635_p1), %s3630_s28, 0 }
  0xa4   : > { %594 = sbr.rel (%p3635_p1) target bundleno = 1521 (0x5f1), region = 88  ;;  %s2228_s15 = sshll.u32 (!%p3635_p1), %s3441_s21, 4 }
  0xa5   : > { %s597_s29 = scalar_lea.sflag (!%p3635_p1), [#allocation5], %s3441_s21  ;;  %s3447_s1 = scalar_lea.vmem (!%p3635_p1), [#allocation4], %s2228_s15 }
  0xa9   : > { %3081 = dma.done.wait (%p3636_p3), %s597_s29, 256  }
  0xaa   : > { %3083 = vsyncadd (%p3636_p3), %s597_s29, 4294967040  ;;  %p3637_p4 = scmp.eq.s32.totalorder %s3249_s0, 0 }
  0xac   : > { %3085 = dma.done.wait (%p3637_p4), [#allocation8], 4096   ;;  %p3638_p6 = pmov %p3637_p4 }
  0xad   : > { %p3639_p8 = pmov %p3637_p4 }
  0xae   : > { %3087 = vsyncadd (%p3638_p6), [#allocation8], 4294963200 }
  0xaf   : > { %3089 = dma.done.wait (%p3639_p8), [#allocation11], 3072   ;;  %p3640_p10 = pmov %p3637_p4 }
  0xb0   : > { %p3641_p7 = pmov %p3637_p4 }
  0xb1   : > { %3091 = vsyncadd (%p3640_p10), [#allocation11], 4294964224 }
  0xb2   : > { %3093 = dma.done.wait (%p3641_p7), [#allocation14], 4096   ;;  %p3642_p11 = pmov %p3637_p4 }
  0xb3   : > { %p3643_p13 = pmov %p3637_p4 }
  0xb4   : > { %3095 = vsyncadd (%p3642_p11), [#allocation14], 4294963200 }
  0xb5   : > { %3097 = dma.done.wait (%p3643_p13), [#allocation17], 3072   ;;  %p3644_p0 = pmov %p3637_p4 }
  0xb6   : > { %v3133_v0 = vmov 0.0   ;;  %v2690_v1 = vld [vmem:[#allocation7 + $0x78] sm:$0xff]   ;;  %v2692_v3 = vld [vmem:[#allocation7 + $0x70] sm:$0xff]   ;;  %v2694_v5 = vld [vmem:[#allocation7 + $0x68] sm:$0xff]   ;;  %vm3134_vm0 = vmmov 0   ;;  %s3645_s7 = sld [smem:[#allocation34_spill]] }
  0xb7   : > { %3099 = vsyncadd (%p3644_p0), [#allocation17], 4294964224  ;;  %684 = vst [vmem:[#allocation2] sm:$0xf] %v3133_v0  ;;  %v2691_v2 = vld [vmem:[#allocation7 + $0x38] sm:$0xff]   ;;  %2365 = vmatprep.subr.bf16.mxu0 %v2690_v1  ;;  %v2693_v4 = vld [vmem:[#allocation7 + $0x30] sm:$0xff]  }
  0xb8   : > { %685 = vst [vmem:[#allocation3] sm:$0xf] %v3133_v0  ;;  %2366 = vmatpush3.bf16.msra.mxu0 %v2691_v2  ;;  %v2695_v6 = vld [vmem:[#allocation7 + $0x28] sm:$0xff]   ;;  %v2696_v7 = vld [vmem:[#allocation7 + $0x60] sm:$0xff]   ;;  %v2698_v9 = vld [vmem:[#allocation7 + $0x58] sm:$0xff]   ;;  %s3646_s30 = sld [smem:[#allocation36_spill]] }
  0xb9   : > { %2367 = vmatprep.subr.bf16.mxu0 %v2692_v3  ;;  %v2697_v8 = vld [vmem:[#allocation7 + $0x20] sm:$0xff]   ;;  %v2699_v10 = vld [vmem:[#allocation7 + $0x18] sm:$0xff]   ;;  %v2700_v11 = vld [vmem:[#allocation7 + $0x50] sm:$0xff]   ;;  %s682_s28 = scalar_lea.vmem [#allocation19], %s2228_s15  ;;  %s2364_s18 = sshll.u32 %s3249_s0, 8 }
  0xba   : > { %v686_v12 = vld [vmem:[%s3447_s1] sm:$0xff]  ;;  %v687_v13 = vld [vmem:[%s3447_s1 + $0x8] sm:$0xff]  ;;  %s2064_s23 = sshll.u32 %s682_s28, 4  ;;  %s3647_s14 = sld [smem:[#allocation37_spill]]  ;;  %s3534_s23 = int_to_ptr.vmem [resolvable:$true] %s2064_s23 }
  0xbb   : > { %v2701_v14 = vld [vmem:[#allocation7 + $0x10] sm:$0xff]   ;;  %688 = vst [vmem:[#allocation2 + $0x4] sm:$0xff] %v686_v12  ;;  %689 = vst [vmem:[#allocation2 + $0xc] sm:$0xff] %v687_v13  ;;  %v3473_v15 = vpack.c.bf16 %v687_v13, %v686_v12  ;;  %v2706_v16 = vld [vmem:[#allocation9 + $0x78] sm:$0xff]   ;;  %s2051_s15 = scalar_lea.sflag [#allocation6], %s3441_s21  ;;  %s3038_s1 = scalar_lea.vmem %s3534_s23, 256 }
  0xbc   : > { %2368 = vmatpush3.bf16.msra.mxu0 %v2693_v4  ;;  %v2707_v17 = vld [vmem:[#allocation9 + $0x38] sm:$0xff]   ;;  %v2702_v18 = vld [vmem:[#allocation7 + $0x48] sm:$0xff]   ;;  %2387 = vmatprep.subr.bf16.mxu1 %v2706_v16  ;;  %v2709_v19 = vld [vmem:[#allocation9 + $0x70] sm:$0xff]   ;;  %p3039_p2 = scmp.ne.s32.totalorder %s3534_s23, %s3038_s1  ;;  %p3648_p5 = scmp.ne.s32.totalorder %s3631_s20, 0 }
  0xbd   : > { %2369 = vmatprep.subr.bf16.mxu0 %v2694_v5  ;;  %863 = vmatprep.mubr.bf16.mxu0 %v3473_v15  ;;  %v2710_v20 = vld [vmem:[#allocation9 + $0x30] sm:$0xff]   ;;  %v2703_v21 = vld [vmem:[#allocation7 + $0x8] sm:$0xff]   ;;  %v2704_v22 = vld [vmem:[#allocation7 + $0x40] sm:$0xff]   ;;  %s3135_s0 = smov [#allocation19]  }
  0xbe   : > { %2388 = vmatpush3.bf16.msra.mxu1 %v2707_v17  ;;  %v2705_v23 = vld [vmem:[#allocation7] sm:$0xff]   ;;  %v2708_v26 = vld [vmem:[#allocation10 + $0x38] sm:$0xff]   ;;  %v2711_v28 = vld [vmem:[#allocation10 + $0x30] sm:$0xff]   ;;  %p3040_p9 = pnand %p3039_p2, %p3648_p5  ;;  %s3042_s3 = sshll.u32 %s3135_s0, 4  ;;  %s3043_s3 = int_to_ptr.vmem [resolvable:$false] %s3042_s3 }
  0xbf   : > { %2389 = vmatprep.subr.bf16.mxu1 %v2709_v19  ;;  %v2712_v29 = vld [vmem:[#allocation9 + $0x68] sm:$0xff]   ;;  %v2715_v32 = vld [vmem:[#allocation9 + $0x60] sm:$0xff]   ;;  %v2718_v35 = vld [vmem:[#allocation9 + $0x58] sm:$0xff]   ;;  %p3045_p1 = scmp.lt.s32.totalorder %s3534_s23, %s3043_s3 }
  0xc0   : > { %2370 = vmatpush3.bf16.msra.mxu0 %v2695_v6  ;;  %v2713_v30 = vld [vmem:[#allocation9 + $0x28] sm:$0xff]   ;;  %v2716_v33 = vld [vmem:[#allocation9 + $0x20] sm:$0xff]   ;;  %v2719_v36 = vld [vmem:[#allocation9 + $0x18] sm:$0xff]   ;;  %s3539_s29 = scalar_lea.hbm %s3647_s14, %s2364_s18  ;;  %p3041_p12 = pneg %p3040_p9 }
  0xc1   : > { %2371 = vmatprep.subr.bf16.mxu0 %v2696_v7  ;;  %v2714_v31 = vld [vmem:[#allocation10 + $0x28] sm:$0xff]   ;;  %v2717_v34 = vld [vmem:[#allocation10 + $0x20] sm:$0xff]   ;;  %v2720_v37 = vld [vmem:[#allocation10 + $0x18] sm:$0xff]  }
  0xc2   : > { %v690_v24 = vld [vmem:[#allocation2 + $0x3] sm:$0xff]  ;;  %v691_v25 = vld [vmem:[#allocation2 + $0xb] sm:$0xff]  ;;  %2390 = vmatpush3.bf16.msra.mxu1 %v2710_v20  ;;  %v2724_v41 = vld [vmem:[#allocation9 + $0x48] sm:$0xff]  }
  0xc3   : > { %v694_v27 = vpack.c.bf16 %v691_v25, %v690_v24  ;;  %2391 = vmatprep.subr.bf16.mxu1 %v2712_v29  ;;  %v2721_v38 = vld [vmem:[#allocation9 + $0x50] sm:$0xff]   ;;  %v2725_v42 = vld [vmem:[#allocation9 + $0x8] sm:$0xff]   ;;  %v2727_v44 = vld [vmem:[#allocation9 + $0x40] sm:$0xff]  }
  0xc4   : > { %2372 = vmatpush3.bf16.msra.mxu0 %v2697_v8  ;;  %v2722_v39 = vld [vmem:[#allocation9 + $0x10] sm:$0xff]   ;;  %v2726_v43 = vld [vmem:[#allocation10 + $0x8] sm:$0xff]   ;;  %v2728_v45 = vld [vmem:[#allocation9] sm:$0xff]  }
  0xc5   : > { %2373 = vmatprep.subr.bf16.mxu0 %v2698_v9  ;;  %v2723_v40 = vld [vmem:[#allocation10 + $0x10] sm:$0xff]   ;;  %v2729_v46 = vld [vmem:[#allocation10] sm:$0xff]   ;;  %v2730_v47 = vld [vmem:[#allocation12 + $0x78] sm:$0xff]  }
  0xc6   : > { %2392 = vmatpush3.bf16.msra.mxu1 %v2713_v30  ;;  %v2238_v49 = vld [vmem:[%s3584_s2] ss:$0 sm:$0xff]  ;;  %v2731_v62 = vld [vmem:[#allocation12 + $0x38] sm:$0xff]   ;;  %v2734_v4 = vld [vmem:[#allocation12 + $0x68] sm:$0xff]  }
  0xc7   : > { %2393 = vmatprep.subr.bf16.mxu1 %v2715_v32  ;;  %v2732_v1 = vld [vmem:[#allocation12 + $0x70] sm:$0xff]   ;;  %v2735_v6 = vld [vmem:[#allocation12 + $0x28] sm:$0xff]   ;;  %v2736_v8 = vld [vmem:[#allocation12 + $0x60] sm:$0xff]  }
  0xc8   : > { %2374 = vmatpush3.bf16.msra.mxu0 %v2699_v10  ;;  %v2733_v2 = vld [vmem:[#allocation12 + $0x30] sm:$0xff]   ;;  %v2737_v10 = vld [vmem:[#allocation12 + $0x20] sm:$0xff]   ;;  %v2739_v12 = vld [vmem:[#allocation12 + $0x18] sm:$0xff]  }
  0xc9   : > { %2375 = vmatprep.subr.bf16.mxu0 %v2700_v11  ;;  %v2738_v11 = vld [vmem:[#allocation12 + $0x58] sm:$0xff]   ;;  %v2740_v13 = vld [vmem:[#allocation12 + $0x50] sm:$0xff]   ;;  %v2743_v16 = vld [vmem:[#allocation12 + $0x8] sm:$0xff]  }
  0xca   : > { %2394 = vmatpush3.bf16.msra.mxu1 %v2716_v33  ;;  %v2744_v17 = vld [vmem:[#allocation12 + $0x40] sm:$0xff]   ;;  %v2746_v19 = vld [vmem:[#allocation13 + $0x78] sm:$0xff]   ;;  %v2272_v24 = vld [vmem:[%s3588_s6] ss:$0 sm:$0xff] }
  0xcb   : > { %2395 = vmatprep.subr.bf16.mxu1 %v2718_v35  ;;  %v2747_v20 = vld [vmem:[#allocation13 + $0x38] sm:$0xff]   ;;  %v2255_v25 = vld [vmem:[%s3586_s4] ss:$0 sm:$0xff] }
  0xcc   : > { %2376 = vmatpush3.bf16.msra.mxu0 %v2701_v14  ;;  %v2741_v14 = vld [vmem:[#allocation12 + $0x10] sm:$0xff]  }
  0xcd   : > { %2377 = vmatprep.subr.bf16.mxu0 %v2702_v18  ;;  %v2745_v18 = vld [vmem:[#allocation12] sm:$0xff]  }
  0xce   : > { %2396 = vmatpush3.bf16.msra.mxu1 %v2719_v36 }
  0xcf   : > { %2397 = vmatprep.subr.bf16.mxu1 %v2721_v38 }
  0xd0   : > { %2378 = vmatpush3.bf16.msra.mxu0 %v2703_v21  ;;  %v2748_v21 = vld [vmem:[#allocation13 + $0x70] sm:$0xff]  }
  0xd1   : > { %2379 = vmatprep.subr.bf16.mxu0 %v2704_v22  ;;  %v2749_v22 = vld [vmem:[#allocation13 + $0x30] sm:$0xff]  }
  0xd2   : > { %2398 = vmatpush3.bf16.msra.mxu1 %v2722_v39 }
  0xd3   : > { %2399 = vmatprep.subr.bf16.mxu1 %v2724_v41 }
  0xd4   : > { %2380 = vmatpush3.bf16.msra.mxu0 %v2705_v23 }
  0xd5   : > { %2515 = vmatprep.subr.bf16.mxu0 %v3133_v0 }
  0xd6   : > { %2400 = vmatpush3.bf16.msra.mxu1 %v2725_v42 }
  0xd7   : > { %864 = vmatmul.mubr.bf16.vlgmr.msra.gmra.mxu0 %v694_v27  ;;  %2401 = vmatprep.subr.bf16.mxu1 %v2727_v44 }
  0xd8   : > { %2516 = vmatpush3.bf16.msra.mxu0 %v2708_v26  ;;  %2531 = vmatprep.mubr.msk.bf16.mxu0 %vm3134_vm0, %v3133_v0 }
  0xd9   : > { %2517 = vmatprep.subr.bf16.mxu0 %v3133_v0 }
  0xda   : > { %2402 = vmatpush3.bf16.msra.mxu1 %v2728_v45  ;;  %v2750_v45 = vld [vmem:[#allocation13 + $0x68] sm:$0xff]  }
  0xdb   : > { %2418 = vmatprep.subr.bf16.mxu1 %v2730_v47  ;;  %v2752_v47 = vld [vmem:[#allocation13 + $0x60] sm:$0xff]  }
  0xdc   : > { %2518 = vmatpush3.bf16.msra.mxu0 %v2711_v28 }
  0xdd   : > { %2519 = vmatprep.subr.bf16.mxu0 %v3133_v0 }
  0xe0   : > { %2520 = vmatpush3.bf16.msra.mxu0 %v2714_v31 }
  0xe1   : > { %2521 = vmatprep.subr.bf16.mxu0 %v3133_v0 }
  0xe4   : > { %2522 = vmatpush3.bf16.msra.mxu0 %v2717_v34 }
  0xe5   : > { %2523 = vmatprep.subr.bf16.mxu0 %v3133_v0 }
  0xe8   : > { %2524 = vmatpush3.bf16.msra.mxu0 %v2720_v37 }
  0xe9   : > { %2525 = vmatprep.subr.bf16.mxu0 %v3133_v0 }
  0xec   : > { %2526 = vmatpush3.bf16.msra.mxu0 %v2723_v40 }
  0xed   : > { %2527 = vmatprep.subr.bf16.mxu0 %v3133_v0 }
  0xf0   : > { %2528 = vmatpush3.bf16.msra.mxu0 %v2726_v43 }
  0xf1   : > { %2529 = vmatprep.subr.bf16.mxu0 %v3133_v0 }
  0xf4   : > { %2530 = vmatpush3.bf16.msra.mxu0 %v2729_v46  ;;  %v2751_v46 = vld [vmem:[#allocation13 + $0x28] sm:$0xff]  }
  0xf5   : > { %2440 = vmatprep.subr.bf16.mxu0 %v2746_v19  ;;  %v2772_v19 = vld [vmem:[#allocation15 + $0x50] sm:$0xff]  }
  0xf7   : > { %2532 = vmatmul.mubr.bf16.vlgmr.msra.gmra.mxu0 %v3473_v15  ;;  %v2742_v15 = vld [vmem:[#allocation12 + $0x48] sm:$0xff]  }
  0xf8   : > { %2441 = vmatpush3.bf16.msra.mxu0 %v2747_v20  ;;  %v2773_v20 = vld [vmem:[#allocation15 + $0x10] sm:$0xff]  }
  0xf9   : > { %2442 = vmatprep.subr.bf16.mxu0 %v2748_v21  ;;  %v2774_v21 = vld [vmem:[#allocation15 + $0x48] sm:$0xff]  }
  0xfc   : > { %2443 = vmatpush3.bf16.msra.mxu0 %v2749_v22  ;;  %v2775_v22 = vld [vmem:[#allocation15 + $0x8] sm:$0xff]  }
  0xfd   : > { %2444 = vmatprep.subr.bf16.mxu0 %v2750_v45 }
 0x100   : > { %2445 = vmatpush3.bf16.msra.mxu0 %v2751_v46 }
 0x101   : > { %2446 = vmatprep.subr.bf16.mxu0 %v2752_v47 }
 0x197   : > { %v2381_v48 = vpop.f32.mrf.mxu0 }
 0x199   : > { %v2382_v50 = vpop.f32.mrf.mxu0 }
 0x19a   : > { %v2383_v51 = vadd.f32 %v2382_v50, %v2381_v48  ;;  %v2753_v48 = vld [vmem:[#allocation13 + $0x20] sm:$0xff]   ;;  %v2755_v50 = vld [vmem:[#allocation13 + $0x18] sm:$0xff]  }
 0x19b   : > { %v2384_v52 = vpop.f32.mrf.mxu0  ;;  %2447 = vmatpush3.bf16.msra.mxu0 %v2753_v48 }
 0x19c   : > { %v866_v53 = vadd.f32 %v2383_v51, %v2238_v49  ;;  %v2756_v51 = vld [vmem:[#allocation13 + $0x50] sm:$0xff]  }
 0x19d   : > { %v2385_v54 = vpop.f32.mrf.mxu0 }
 0x19e   : > { %v872_v55 = vmax.f32 %v866_v53, 0.0  ;;  %v2386_v56 = vadd.f32 %v2385_v54, %v2384_v52  ;;  %v2757_v52 = vld [vmem:[#allocation13 + $0x10] sm:$0xff]   ;;  %v2758_v53 = vld [vmem:[#allocation13 + $0x48] sm:$0xff]  }
 0x19f   : > { %v2759_v54 = vld [vmem:[#allocation13 + $0x8] sm:$0xff]  }
 0x1a0   : > { %874 = vst [vmem:[#allocation3 + $0x4] sm:$0xff] %v872_v55  ;;  %v869_v57 = vadd.f32 %v2386_v56, %v2238_v49  ;;  %v2754_v49 = vld [vmem:[#allocation13 + $0x58] sm:$0xff]   ;;  %v2761_v56 = vld [vmem:[#allocation13] sm:$0xff]  }
 0x1a1   : > { %2448 = vmatprep.subr.bf16.mxu0 %v2754_v49  ;;  %v2778_v49 = vld [vmem:[#allocation18 + $0x38] sm:$0xff]  }
 0x1a2   : > { %v873_v58 = vmax.f32 %v869_v57, 0.0  ;;  %2449 = vmatpush3.bf16.msra.mxu0 %v2755_v50  ;;  %v2762_v57 = vld [vmem:[#allocation15 + $0x78] sm:$0xff]  }
 0x1a3   : > { %2450 = vmatprep.subr.bf16.mxu0 %v2756_v51  ;;  %v2779_v51 = vld [vmem:[#allocation18 + $0x30] sm:$0xff]  }
 0x1a4   : > { %875 = vst [vmem:[#allocation3 + $0xc] sm:$0xff] %v873_v58  ;;  %v881_v59 = vpack.c.bf16 %v873_v58, %v872_v55  ;;  %v2760_v55 = vld [vmem:[#allocation13 + $0x40] sm:$0xff]   ;;  %v2763_v58 = vld [vmem:[#allocation15 + $0x38] sm:$0xff]  }
 0x1a6   : > { %1049 = vmatprep.mubr.bf16.mxu1 %v881_v59  ;;  %2451 = vmatpush3.bf16.msra.mxu0 %v2757_v52  ;;  %v2764_v59 = vld [vmem:[#allocation15 + $0x70] sm:$0xff]   ;;  %v2782_v52 = vld [vmem:[#allocation18 + $0x18] sm:$0xff]  }
 0x1a7   : > { %v876_v60 = vld [vmem:[#allocation3 + $0x3] sm:$0xff]  ;;  %2452 = vmatprep.subr.bf16.mxu0 %v2758_v53 }
 0x1a8   : > { %v2783_v53 = vld [vmem:[#allocation18 + $0x10] sm:$0xff]  }
 0x1aa   : > { %2453 = vmatpush3.bf16.msra.mxu0 %v2759_v54  ;;  %v2784_v54 = vld [vmem:[#allocation18 + $0x8] sm:$0xff]  }
 0x1ab   : > { %v877_v61 = vld [vmem:[#allocation3 + $0xb] sm:$0xff]  ;;  %2454 = vmatprep.subr.bf16.mxu0 %v2760_v55  ;;  %v2785_v55 = vld [vmem:[#allocation18] sm:$0xff]  }
 0x1ac   : > { %v880_v63 = vpack.c.bf16 %v877_v61, %v876_v60  ;;  %v2281_v61 = vld [vmem:[%s3590_s8] ss:$0 sm:$0xff] }
 0x1ae   : > { %1050 = vmatmul.mubr.bf16.vlgmr.msra.gmra.mxu1 %v880_v63  ;;  %2455 = vmatpush3.bf16.msra.mxu0 %v2761_v56  ;;  %v2790_v56 = vld [vmem:[#allocation16 + $0x68] sm:$0xff]  }
 0x1af   : > { %2419 = vmatpush3.bf16.msra.mxu1 %v2731_v62 }
 0x1b0   : > { %2420 = vmatprep.subr.bf16.mxu1 %v2732_v1 }
 0x1b3   : > { %2421 = vmatpush3.bf16.msra.mxu1 %v2733_v2 }
 0x1b4   : > { %2422 = vmatprep.subr.bf16.mxu1 %v2734_v4 }
 0x1b7   : > { %v1168_v3 = vpop.f32.mrf.mxu0  ;;  %2423 = vmatpush3.bf16.msra.mxu1 %v2735_v6 }
 0x1b8   : > { %2424 = vmatprep.subr.bf16.mxu1 %v2736_v8  ;;  %v1169_v29 = vadd.f32 %v2272_v24, %v1168_v3 }
 0x1b9   : > { %v2533_v5 = vpop.f32.mrf.mxu0 }
 0x1bb   : > { %v1171_v7 = vpop.f32.mrf.mxu0  ;;  %2425 = vmatpush3.bf16.msra.mxu1 %v2737_v10 }
 0x1bc   : > { %2426 = vmatprep.subr.bf16.mxu1 %v2738_v11  ;;  %v1172_v37 = vadd.f32 %v2272_v24, %v1171_v7  ;;  %v2777_v24 = vld [vmem:[#allocation15] sm:$0xff]  }
 0x1bd   : > { %v2534_v9 = vpop.f32.mrf.mxu0 }
 0x1bf   : > { %2427 = vmatpush3.bf16.msra.mxu1 %v2739_v12  ;;  %v2765_v12 = vld [vmem:[#allocation15 + $0x30] sm:$0xff]  }
 0x1c0   : > { %2428 = vmatprep.subr.bf16.mxu1 %v2740_v13  ;;  %v2766_v13 = vld [vmem:[#allocation15 + $0x68] sm:$0xff]  }
 0x1c3   : > { %2429 = vmatpush3.bf16.msra.mxu1 %v2741_v14  ;;  %v2767_v14 = vld [vmem:[#allocation15 + $0x28] sm:$0xff]  }
 0x1c4   : > { %2430 = vmatprep.subr.bf16.mxu1 %v2742_v15  ;;  %v2768_v15 = vld [vmem:[#allocation15 + $0x60] sm:$0xff]  }
 0x1c7   : > { %2431 = vmatpush3.bf16.msra.mxu1 %v2743_v16  ;;  %v2769_v16 = vld [vmem:[#allocation15 + $0x20] sm:$0xff]  }
 0x1c8   : > { %2432 = vmatprep.subr.bf16.mxu1 %v2744_v17  ;;  %v2770_v17 = vld [vmem:[#allocation15 + $0x58] sm:$0xff]  }
 0x1cb   : > { %2433 = vmatpush3.bf16.msra.mxu1 %v2745_v18  ;;  %v2771_v18 = vld [vmem:[#allocation15 + $0x18] sm:$0xff]  }
 0x1cc   : > { %2462 = vmatprep.subr.bf16.mxu1 %v2762_v57  ;;  %v2791_v57 = vld [vmem:[#allocation16 + $0x28] sm:$0xff]  }
 0x26e   : > { %v2403_v23 = vpop.f32.mrf.mxu1 }
 0x270   : > { %v2404_v26 = vpop.f32.mrf.mxu1 }
 0x271   : > { %v2405_v27 = vadd.f32 %v2404_v26, %v2403_v23  ;;  %v2776_v23 = vld [vmem:[#allocation15 + $0x40] sm:$0xff]   ;;  %v2787_v26 = vld [vmem:[#allocation16 + $0x38] sm:$0xff]  }
 0x272   : > { %v2406_v28 = vpop.f32.mrf.mxu1 }
 0x273   : > { %v1052_v30 = vadd.f32 %v2405_v27, %v2255_v25  ;;  %v2788_v27 = vld [vmem:[#allocation16 + $0x70] sm:$0xff]  }
 0x274   : > { %v2407_v31 = vpop.f32.mrf.mxu1 }
 0x275   : > { %v1058_v32 = vmax.f32 %v1052_v30, 0.0  ;;  %v2408_v33 = vadd.f32 %v2407_v31, %v2406_v28  ;;  %v2789_v28 = vld [vmem:[#allocation16 + $0x30] sm:$0xff]  }
 0x276   : > { %v2298_v30 = vld [vmem:[%s3592_s10] ss:$0 sm:$0xff] }
 0x277   : > { %v1175_v34 = vadd.f32 %v1169_v29, %v1058_v32  ;;  %v1055_v35 = vadd.f32 %v2408_v33, %v2255_v25  ;;  %v2786_v25 = vld [vmem:[#allocation16 + $0x78] sm:$0xff]  }
 0x278   : > { %2484 = vmatprep.subr.bf16.mxu0 %v2786_v25 }
 0x279   : > { %v3496_v36 = vmax.f32 %v1175_v34, 0.0  ;;  %v1059_v38 = vmax.f32 %v1055_v35, 0.0 }
 0x27b   : > { %1179 = vst [vmem:[#allocation2 + $0x4] sm:$0xff] %v3496_v36  ;;  %v1176_v39 = vadd.f32 %v1172_v37, %v1059_v38 }
 0x27d   : > { %v3499_v40 = vmax.f32 %v1176_v39, 0.0 }
 0x27f   : > { %1180 = vst [vmem:[#allocation2 + $0xc] sm:$0xff] %v3499_v40  ;;  %v1186_v41 = vpack.c.bf16 %v3499_v40, %v3496_v36 }
 0x281   : > { %1354 = vmatprep.mubr.bf16.mxu1 %v1186_v41 }
 0x282   : > { %v1181_v42 = vld [vmem:[#allocation2 + $0x2] sm:$0xff] }
 0x286   : > { %v1182_v43 = vld [vmem:[#allocation2 + $0xa] sm:$0xff] }
 0x287   : > { %v1185_v44 = vpack.c.bf16 %v1182_v43, %v1181_v42 }
 0x289   : > { %1355 = vmatmul.mubr.bf16.vlgmr.msra.gmra.mxu1 %v1185_v44 }
 0x28a   : > { %2463 = vmatpush3.bf16.msra.mxu1 %v2763_v58  ;;  %v2792_v58 = vld [vmem:[#allocation16 + $0x60] sm:$0xff]  }
 0x28b   : > { %2464 = vmatprep.subr.bf16.mxu1 %v2764_v59  ;;  %v2793_v59 = vld [vmem:[#allocation16 + $0x20] sm:$0xff]  }
 0x28e   : > { %2465 = vmatpush3.bf16.msra.mxu1 %v2765_v12 }
 0x28f   : > { %2466 = vmatprep.subr.bf16.mxu1 %v2766_v13 }
 0x292   : > { %2467 = vmatpush3.bf16.msra.mxu1 %v2767_v14 }
 0x293   : > { %2468 = vmatprep.subr.bf16.mxu1 %v2768_v15 }
 0x296   : > { %2469 = vmatpush3.bf16.msra.mxu1 %v2769_v16 }
 0x297   : > { %2470 = vmatprep.subr.bf16.mxu1 %v2770_v17 }
 0x29a   : > { %2471 = vmatpush3.bf16.msra.mxu1 %v2771_v18 }
 0x29b   : > { %2472 = vmatprep.subr.bf16.mxu1 %v2772_v19 }
 0x29e   : > { %2473 = vmatpush3.bf16.msra.mxu1 %v2773_v20 }
 0x29f   : > { %2474 = vmatprep.subr.bf16.mxu1 %v2774_v21 }
 0x2a2   : > { %2475 = vmatpush3.bf16.msra.mxu1 %v2775_v22 }
 0x2a3   : > { %2476 = vmatprep.subr.bf16.mxu1 %v2776_v23 }
 0x2a6   : > { %2477 = vmatpush3.bf16.msra.mxu1 %v2777_v24  ;;  %v2332_v24 = vld [vmem:[%s3645_s7] ss:$0 sm:$0xff]  ;;  %s3044_s7 = scalar_lea.vmem %s3043_s3, 512 }
 0x2a7   : > { %2535 = vmatprep.subr.bf16.mxu1 %v3133_v0  ;;  %p3046_p3 = scmp.lt.s32.totalorder %s3044_s7, %s3038_s1 }
 0x2a9   : > { %p3047_p4 = por %p3046_p3, %p3045_p1 }
 0x2ab   : > { %p3048_p6 = pnand %p3047_p4, %p3041_p12 }
 0x349   : > { %v2434_v60 = vpop.f32.mrf.mxu1 }
 0x34b   : > { %v2435_v62 = vpop.f32.mrf.mxu1 }
 0x34c   : > { %v2436_v63 = vadd.f32 %v2435_v62, %v2434_v60  ;;  %v2794_v60 = vld [vmem:[#allocation16 + $0x58] sm:$0xff]   ;;  %v2796_v62 = vld [vmem:[#allocation16 + $0x50] sm:$0xff]  }
 0x34d   : > { %v2437_v1 = vpop.f32.mrf.mxu1 }
 0x34e   : > { %v1357_v2 = vadd.f32 %v2436_v63, %v2281_v61  ;;  %v2797_v63 = vld [vmem:[#allocation16 + $0x10] sm:$0xff]  }
 0x34f   : > { %v2438_v3 = vpop.f32.mrf.mxu1 }
 0x350   : > { %v1363_v4 = vmax.f32 %v1357_v2, 0.0  ;;  %v2439_v5 = vadd.f32 %v2438_v3, %v2437_v1  ;;  %v2798_v1 = vld [vmem:[#allocation16 + $0x48] sm:$0xff]   ;;  %v2800_v2 = vld [vmem:[#allocation16 + $0x40] sm:$0xff]  }
 0x351   : > { %v2801_v3 = vld [vmem:[#allocation16] sm:$0xff]  }
 0x352   : > { %1365 = vst [vmem:[#allocation3 + $0x4] sm:$0xff] %v1363_v4  ;;  %v1360_v6 = vadd.f32 %v2439_v5, %v2281_v61  ;;  %v2795_v61 = vld [vmem:[#allocation16 + $0x18] sm:$0xff]   ;;  %v2315_v5 = vld [vmem:[%s3594_s12] ss:$0 sm:$0xff] }
 0x354   : > { %v1364_v7 = vmax.f32 %v1360_v6, 0.0 }
 0x356   : > { %1366 = vst [vmem:[#allocation3 + $0xc] sm:$0xff] %v1364_v7  ;;  %v1372_v8 = vpack.c.bf16 %v1364_v7, %v1363_v4 }
 0x358   : > { %1540 = vmatprep.mubr.bf16.mxu0 %v1372_v8 }
 0x359   : > { %v1367_v9 = vld [vmem:[#allocation3 + $0x2] sm:$0xff] }
 0x35d   : > { %v1368_v10 = vld [vmem:[#allocation3 + $0xa] sm:$0xff] }
 0x35e   : > { %v1371_v11 = vpack.c.bf16 %v1368_v10, %v1367_v9 }
 0x360   : > { %1541 = vmatmul.mubr.bf16.vlgmr.msra.gmra.mxu0 %v1371_v11 }
 0x361   : > { %2485 = vmatpush3.bf16.msra.mxu0 %v2787_v26 }
 0x362   : > { %2486 = vmatprep.subr.bf16.mxu0 %v2788_v27  ;;  %v2349_v27 = vld [vmem:[%s3646_s30] ss:$0 sm:$0xff] }
 0x365   : > { %2487 = vmatpush3.bf16.msra.mxu0 %v2789_v28 }
 0x366   : > { %2488 = vmatprep.subr.bf16.mxu0 %v2790_v56 }
 0x369   : > { %2489 = vmatpush3.bf16.msra.mxu0 %v2791_v57 }
 0x36a   : > { %2490 = vmatprep.subr.bf16.mxu0 %v2792_v58 }
 0x36d   : > { %2491 = vmatpush3.bf16.msra.mxu0 %v2793_v59 }
 0x36e   : > { %2492 = vmatprep.subr.bf16.mxu0 %v2794_v60 }
 0x371   : > { %2493 = vmatpush3.bf16.msra.mxu0 %v2795_v61 }
 0x372   : > { %2494 = vmatprep.subr.bf16.mxu0 %v2796_v62 }
 0x375   : > { %2495 = vmatpush3.bf16.msra.mxu0 %v2797_v63 }
 0x376   : > { %2496 = vmatprep.subr.bf16.mxu0 %v2798_v1 }
 0x420   : > { %v2456_v29 = vpop.f32.mrf.mxu0 }
 0x422   : > { %v2457_v31 = vpop.f32.mrf.mxu0 }
 0x423   : > { %v2458_v32 = vadd.f32 %v2457_v31, %v2456_v29 }
 0x424   : > { %v2459_v33 = vpop.f32.mrf.mxu0 }
 0x425   : > { %v1543_v34 = vadd.f32 %v2458_v32, %v2298_v30 }
 0x426   : > { %v2460_v35 = vpop.f32.mrf.mxu0 }
 0x427   : > { %v1549_v37 = vmax.f32 %v1543_v34, 0.0  ;;  %v2461_v38 = vadd.f32 %v2460_v35, %v2459_v33 }
 0x429   : > { %v1553_v39 = vadd.f32 %v1549_v37, %v3496_v36  ;;  %v1546_v41 = vadd.f32 %v2461_v38, %v2298_v30  ;;  %v2780_v36 = vld [vmem:[#allocation18 + $0x28] sm:$0xff]  }
 0x42b   : > { %v1555_v42 = vmax.f32 %v1553_v39, 0.0  ;;  %v1550_v43 = vmax.f32 %v1546_v41, 0.0 }
 0x42d   : > { %1557 = vst [vmem:[#allocation2 + $0x4] sm:$0xff] %v1555_v42  ;;  %v1554_v44 = vadd.f32 %v1550_v43, %v3499_v40  ;;  %v2781_v40 = vld [vmem:[#allocation18 + $0x20] sm:$0xff]  }
 0x42f   : > { %v1556_v45 = vmax.f32 %v1554_v44, 0.0 }
 0x431   : > { %1558 = vst [vmem:[#allocation2 + $0xc] sm:$0xff] %v1556_v45  ;;  %v1564_v46 = vpack.c.bf16 %v1556_v45, %v1555_v42 }
 0x433   : > { %1732 = vmatprep.mubr.bf16.mxu1 %v1564_v46 }
 0x434   : > { %v1559_v47 = vld [vmem:[#allocation2] sm:$0xff] }
 0x438   : > { %v1560_v48 = vld [vmem:[#allocation2 + $0x8] sm:$0xff] }
 0x439   : > { %v1563_v50 = vpack.c.bf16 %v1560_v48, %v1559_v47 }
 0x43b   : > { %1733 = vmatmul.mubr.bf16.vlgmr.msra.gmra.mxu1 %v1563_v50 }
 0x43c   : > { %2536 = vmatpush3.bf16.msra.mxu1 %v2778_v49  ;;  %2551 = vmatprep.mubr.msk.bf16.mxu1 %vm3134_vm0, %v3133_v0 }
 0x43d   : > { %2537 = vmatprep.subr.bf16.mxu1 %v3133_v0 }
 0x440   : > { %2538 = vmatpush3.bf16.msra.mxu1 %v2779_v51 }
 0x441   : > { %2539 = vmatprep.subr.bf16.mxu1 %v3133_v0 }
 0x444   : > { %2540 = vmatpush3.bf16.msra.mxu1 %v2780_v36 }
 0x445   : > { %2541 = vmatprep.subr.bf16.mxu1 %v3133_v0 }
 0x448   : > { %2542 = vmatpush3.bf16.msra.mxu1 %v2781_v40 }
 0x449   : > { %2543 = vmatprep.subr.bf16.mxu1 %v3133_v0 }
 0x44c   : > { %2544 = vmatpush3.bf16.msra.mxu1 %v2782_v52 }
 0x44d   : > { %2545 = vmatprep.subr.bf16.mxu1 %v3133_v0 }
 0x450   : > { %2546 = vmatpush3.bf16.msra.mxu1 %v2783_v53 }
 0x451   : > { %2547 = vmatprep.subr.bf16.mxu1 %v3133_v0 }
 0x454   : > { %2548 = vmatpush3.bf16.msra.mxu1 %v2784_v54 }
 0x455   : > { %2549 = vmatprep.subr.bf16.mxu1 %v3133_v0  ;;  %v2799_v0 = vld [vmem:[#allocation16 + $0x8] sm:$0xff]  }
 0x456   : > { %2497 = vmatpush3.bf16.msra.mxu0 %v2799_v0 }
 0x457   : > { %2498 = vmatprep.subr.bf16.mxu0 %v2800_v2 }
 0x458   : > { %2550 = vmatpush3.bf16.msra.mxu1 %v2785_v55 }
 0x45a   : > { %2499 = vmatpush3.bf16.msra.mxu0 %v2801_v3 }
 0x45b   : > { %2552 = vmatmul.mubr.bf16.vlgmr.msra.gmra.mxu1 %v1564_v46 }
 0x4fb   : > { %v2478_v4 = vpop.f32.mrf.mxu1 }
 0x4fd   : > { %v2479_v6 = vpop.f32.mrf.mxu1 }
 0x4fe   : > { %v2480_v7 = vadd.f32 %v2479_v6, %v2478_v4 }
 0x4ff   : > { %v2481_v8 = vpop.f32.mrf.mxu1 }
 0x500   : > { %v1735_v9 = vadd.f32 %v2480_v7, %v2315_v5 }
 0x501   : > { %v2482_v10 = vpop.f32.mrf.mxu1 }
 0x502   : > { %v1741_v11 = vmax.f32 %v1735_v9, 0.0  ;;  %v2483_v12 = vadd.f32 %v2482_v10, %v2481_v8 }
 0x504   : > { %1743 = vst [vmem:[#allocation3 + $0x4] sm:$0xff] %v1741_v11  ;;  %v1738_v13 = vadd.f32 %v2483_v12, %v2315_v5 }
 0x506   : > { %v1742_v14 = vmax.f32 %v1738_v13, 0.0 }
 0x508   : > { %1744 = vst [vmem:[#allocation3 + $0xc] sm:$0xff] %v1742_v14  ;;  %v1750_v15 = vpack.c.bf16 %v1742_v14, %v1741_v11 }
 0x50a   : > { %1918 = vmatprep.mubr.bf16.mxu0 %v1750_v15 }
 0x50b   : > { %v1745_v16 = vld [vmem:[#allocation3] sm:$0xff] }
 0x50f   : > { %v1746_v17 = vld [vmem:[#allocation3 + $0x8] sm:$0xff] }
 0x510   : > { %v1749_v18 = vpack.c.bf16 %v1746_v17, %v1745_v16 }
 0x512   : > { %1919 = vmatmul.mubr.bf16.vlgmr.msra.gmra.mxu0 %v1749_v18 }
 0x51b   : > { %v2037_v19 = vpop.f32.mrf.mxu1 }
 0x51c   : > { %v2038_v31 = vadd.f32 %v2349_v27, %v2037_v19 }
 0x51d   : > { %v2553_v20 = vpop.f32.mrf.mxu1 }
 0x51f   : > { %v2040_v21 = vpop.f32.mrf.mxu1 }
 0x520   : > { %v2041_v37 = vadd.f32 %v2349_v27, %v2040_v21 }
 0x521   : > { %v2554_v22 = vpop.f32.mrf.mxu1 }
 0x5d2   : > { %v2500_v23 = vpop.f32.mrf.mxu0 }
 0x5d4   : > { %v2501_v25 = vpop.f32.mrf.mxu0 }
 0x5d5   : > { %v2502_v26 = vadd.f32 %v2501_v25, %v2500_v23 }
 0x5d6   : > { %v2503_v28 = vpop.f32.mrf.mxu0 }
 0x5d7   : > { %v1921_v29 = vadd.f32 %v2502_v26, %v2332_v24 }
 0x5d8   : > { %v2504_v30 = vpop.f32.mrf.mxu0 }
 0x5d9   : > { %v1927_v32 = vmax.f32 %v1921_v29, 0.0  ;;  %v2505_v33 = vadd.f32 %v2504_v30, %v2503_v28 }
 0x5db   : > { %v2044_v34 = vadd.f32 %v2038_v31, %v1927_v32  ;;  %v1924_v35 = vadd.f32 %v2505_v33, %v2332_v24 }
 0x5dd   : > { %v2046_v38 = vmax.f32 %v2044_v34, 0.0  ;;  %v1928_v39 = vmax.f32 %v1924_v35, 0.0 }
 0x5df   : > { %2048 = vst [vmem:[%s682_s28] sm:$0xff] %v2046_v38  ;;  %v2045_v41 = vadd.f32 %v2041_v37, %v1928_v39 }
 0x5e1   : > { %v2047_v42 = vmax.f32 %v2045_v41, 0.0 }
 0x5e3   : > { %2049 = vst [vmem:[%s682_s28 + $0x8] sm:$0xff] %v2047_v42 }
 0x5e4   : > { %3051 = shalt.err (!%p3048_p6)
}
 0x5e5   : > { %s3052_s9 = scalar_lea.hbm %s3539_s29, 256  ;;  %s3056_s28 = scalar_lea.hbm %s3647_s14, 512 }
 0x5e6   : > { %p3053_p8 = scmp.ne.s32.totalorder %s3539_s29, %s3052_s9  ;;  %p3057_p11 = scmp.lt.s32.totalorder %s3539_s29, %s3647_s14 }
 0x5e7   : > { %p3058_p13 = scmp.lt.s32.totalorder %s3056_s28, %s3052_s9 }
 0x5e8   : > { %p3054_p10 = pnand %p3053_p8, %p3648_p5 }
 0x5e9   : > { %p3059_p0 = por %p3058_p13, %p3057_p11 }
 0x5ea   : > { %p3055_p7 = pneg %p3054_p10 }
 0x5ec   : > { %p3060_p2 = pnand %p3059_p0, %p3055_p7 }
 0x5ee   : > { %3063 = shalt.err (!%p3060_p2)
}
 0x5ef   : > { %s3136_s13 = smov 128   ;;  %s3137_s1 = smov 8  }
 0x5f0   : > { %2589 = dma.vmem_to_hbm [thread:$0]  (%p3648_p5), %s3534_s23, 256, %s3539_s29, %s2051_s15, %s3136_s13, %s3136_s13, %s3137_s1  }
 0x5f1 PF: > { %s2079_s0 = sand.u32 1, %s3106_s24   ;;  %p3649_p9 = scmp.ne.s32.totalorder %s3632_s16, 0 }
 0x5f2   : > { %p3650_p12 = scmp.ge.s32.totalorder %s3118_s27, 2  ;;  %s2080_s3 = scalar_lea.sflag [#allocation6], %s2079_s0 }
 0x5f4   : > { %p2621_p1 = pnand %p3650_p12, %p3649_p9 }
 0x5f6   : > { %p2622_p3 = pneg %p2621_p1 }
 0x5f8   : > { %3101 = dma.done.wait (%p2622_p3), %s2080_s3, 256  }
 0x5f9   : > { %3103 = vsyncadd (%p2622_p3), %s2080_s3, 4294967040  ;;  %p34_p4 = scmp.ge.s32.totalorder %s3369_s22, 4   ;;  %s3651_s24 = smov %s3110_s25 }
 0x5fa   : > { %s3652_s25 = smov %s3114_s26  ;;  %s3653_s26 = smov %s3380_s5 }
 0x5fb   : > { %s3654_s27 = smov %s3369_s22  ;;  %36 = sbr.rel (!%p34_p4) target bundleno = 22 (0x16), region = 165 }
 0x600   :  { %2085 = vsyncpa [#allocation5], 1 }
 0x601   :  { %2087 = vsyncpa [#allocation5 + $0x1], 1 }
 0x602   :  { %2088 = vsyncpa [#allocation8], 1 }
 0x603   :  { %2089 = vsyncpa [#allocation11], 1 }
 0x604   :  { %2090 = vsyncpa [#allocation14], 1 }
 0x605   :  { %2091 = vsyncpa [#allocation17], 1 }
 0x606   :  { %2092 = vsyncpa [#allocation6], 1 }
 0x607   :  { %2094 = vsyncpa [#allocation6 + $0x1], 1 }

</bundles_post_ra>
